<compile_context>
chip_gen: v7x
topology: tpu7x:2x2x1
jax: 0.10.0
libtpu: 0.0.40
codegen_flags: <defaults>
</compile_context>

<pallas_src>
import functools

import jax
import jax.numpy as jnp
from jax.experimental import pallas as pl
from jax.experimental.pallas import tpu as pltpu

EPS = 1e-5          # nn.BatchNorm2d default eps
LANE = 128          # TPU lane width -> lane-dense output channels


def _round_up(x, m):
    return (x + m - 1) // m * m


# ---------------------------------------------------------------------------
# Pass 1: implicit-GEMM 3x3 conv (padding=1, stride=1) + bias for one image per
# grid step, plus per-channel sum / sum-of-squares accumulated across the grid.
# ---------------------------------------------------------------------------
def conv_stats_kernel(xf_ref, w_ref, b_ref, mask_ref, y_ref, stats_ref, *, wp):
    rows, _ = y_ref.shape                    # rows = H * Wp ("wide" rows, 1 image)

    acc = jnp.zeros(y_ref.shape, jnp.float32)
    # 9-tap implicit GEMM, unrolled so the scheduler sees every matmul.
    for kh in range(3):
        for kw in range(3):
            tap = xf_ref[0, pl.ds(kh * wp + kw, rows), :]        # (rows, C_in)
            acc = acc + jnp.dot(tap, w_ref[kh * 3 + kw],
                                preferred_element_type=jnp.float32)

    y = acc + b_ref[...]                                         # (rows, C_out_pad)
    y_ref[...] = y

    # BatchNorm pass-1 statistics; junk wide-columns masked out (mask is 0/1).
    yv = y * mask_ref[...]                                       # (rows, 1) mask
    ps = jnp.sum(yv, axis=0, keepdims=True)                      # sum
    pss = jnp.sum(yv * y, axis=0, keepdims=True)                 # sum of squares

    @pl.when(pl.program_id(0) == 0)
    def _init():
        stats_ref[...] = jnp.zeros_like(stats_ref)

    stats_ref[0:1, :] = stats_ref[0:1, :] + ps
    stats_ref[1:2, :] = stats_ref[1:2, :] + pss


# ---------------------------------------------------------------------------
# Pass 2: training-mode BatchNorm (biased batch variance) + ReLU, row-tiled.
# ---------------------------------------------------------------------------
def bn_relu_kernel(y_ref, stats_ref, gamma_ref, beta_ref, o_ref, *, inv_count):
    mean = stats_ref[0:1, :] * inv_count
    var = stats_ref[1:2, :] * inv_count - mean * mean            # biased variance
    scale = gamma_ref[...] * jax.lax.rsqrt(var + EPS)            # EUP rsqrt
    shift = beta_ref[...] - mean * scale
    o_ref[...] = jnp.maximum(y_ref[...] * scale + shift, 0.0)


def conv_bn_relu(x, weight, bias, gamma, beta):
    """Conv2d(3x3, pad=1) -> BatchNorm2d (batch stats) -> ReLU.  NCHW in/out."""
    N, C, H, W = x.shape
    out_c = weight.shape[0]
    co_pad = _round_up(out_c, LANE)
    Hp, Wp = H + 2, W + 2
    rows = H * Wp                 # "wide" rows per image
    Rw = N * rows                 # total wide rows
    count = N * H * W             # valid elements per channel for the BN stats
    f32 = jnp.float32

    # ---- host-side layout plumbing (transpose / pad / flatten, no expansion) ----
    x_nhwc = jnp.transpose(x.astype(f32), (0, 2, 3, 1))
    xp = jnp.pad(x_nhwc, ((0, 0), (1, 1), (1, 1), (0, 0)))        # (N, Hp, Wp, C)
    xf = xp.reshape(N, Hp * Wp, C)
    xf = jnp.pad(xf, ((0, 0), (0, 2), (0, 0)))                    # tail for kh=kw=2 tap
    flat_rows = Hp * Wp + 2

    # OIHW -> (9, C_in, co_pad), tap index = kh*3 + kw; zero-pad the lane axis.
    wt = jnp.transpose(weight.astype(f32), (2, 3, 1, 0)).reshape(9, C, out_c)
    wt = jnp.pad(wt, ((0, 0), (0, 0), (0, co_pad - out_c)))
    b2 = jnp.pad(bias.astype(f32).reshape(1, out_c), ((0, 0), (0, co_pad - out_c)))
    g2 = jnp.pad(gamma.astype(f32).reshape(1, out_c), ((0, 0), (0, co_pad - out_c)))
    be2 = jnp.pad(beta.astype(f32).reshape(1, out_c), ((0, 0), (0, co_pad - out_c)))

    # 0/1 mask over the wide row axis: keep w < W, drop the Wp-W junk columns.
    mask = (jnp.arange(rows) % Wp < W).astype(f32).reshape(rows, 1)

    # ---- pass 1: conv + bias + per-channel stats (grid over batch) ----
    flops1 = 2 * Rw * 9 * C * co_pad
    bytes1 = 4 * (xf.size + wt.size + b2.size + mask.size + Rw * co_pad + 2 * co_pad)
    y_wide, stats = pl.pallas_call(
        functools.partial(conv_stats_kernel, wp=Wp),
        out_shape=(jax.ShapeDtypeStruct((Rw, co_pad), f32),
                   jax.ShapeDtypeStruct((2, co_pad), f32)),
        grid=(N,),
        in_specs=[
            pl.BlockSpec((1, flat_rows, C), lambda n: (n, 0, 0)),
            pl.BlockSpec((9, C, co_pad), lambda n: (0, 0, 0)),
            pl.BlockSpec((1, co_pad), lambda n: (0, 0)),
            pl.BlockSpec((rows, 1), lambda n: (0, 0)),
        ],
        out_specs=(
            pl.BlockSpec((rows, co_pad), lambda n: (n, 0)),
            pl.BlockSpec((2, co_pad), lambda n: (0, 0)),     # resident accumulator
        ),
        compiler_params=pltpu.CompilerParams(
            dimension_semantics=("arbitrary",),   # stats accumulate across the grid
            vmem_limit_bytes=32 * 1024 * 1024),
        cost_estimate=pl.CostEstimate(flops=flops1, transcendentals=0,
                                      bytes_accessed=bytes1),
    )(xf, wt, b2, mask)

    # ---- pass 2: BN (biased batch stats) + ReLU, tiled over rows ----
    tile_r = rows if rows % 8 == 0 else Rw
    flops2 = 4 * Rw * co_pad
    bytes2 = 4 * (2 * Rw * co_pad + 6 * co_pad)
    y_bn = pl.pallas_call(
        functools.partial(bn_relu_kernel, inv_count=1.0 / float(count)),
        out_shape=jax.ShapeDtypeStruct((Rw, co_pad), f32),
        grid=(Rw // tile_r,),
        in_specs=[
            pl.BlockSpec((tile_r, co_pad), lambda i: (i, 0)),
            pl.BlockSpec((2, co_pad), lambda i: (0, 0)),
            pl.BlockSpec((1, co_pad), lambda i: (0, 0)),
            pl.BlockSpec((1, co_pad), lambda i: (0, 0)),
        ],
        out_specs=pl.BlockSpec((tile_r, co_pad), lambda i: (i, 0)),
        compiler_params=pltpu.CompilerParams(
            dimension_semantics=("parallel",),    # megacore-shardable on v7x
            vmem_limit_bytes=32 * 1024 * 1024),
        cost_estimate=pl.CostEstimate(flops=flops2, transcendentals=co_pad,
                                      bytes_accessed=bytes2),
    )(y_wide, stats, g2, be2)

    # Drop the junk wide columns and the padded channels, back to NCHW.
    out = y_bn.reshape(N, H, Wp, co_pad)[:, :, :W, :out_c]
    return jnp.transpose(out, (0, 3, 1, 2))


def reference(x, weight, bias, gamma, beta):
    """Pure-JAX reference reproducing the PyTorch forward (training-mode BN)."""
    y = jax.lax.conv_general_dilated(
        x, weight, window_strides=(1, 1), padding=((1, 1), (1, 1)),
        dimension_numbers=("NCHW", "OIHW", "NCHW"))
    y = y + bias[None, :, None, None]
    mean = jnp.mean(y, axis=(0, 2, 3), keepdims=True)
    var = jnp.mean(jnp.square(y - mean), axis=(0, 2, 3), keepdims=True)
    y = (y - mean) * jax.lax.rsqrt(var + EPS)
    y = y * gamma[None, :, None, None] + beta[None, :, None, None]
    return jnp.maximum(y, 0.0)


if __name__ == "__main__":
    key = jax.random.PRNGKey(0)
    k_x, k_w, k_b = jax.random.split(key, 3)

    N, C_in, C_out, H, W = 2, 4, 8, 16, 16

    x = jax.random.normal(k_x, (N, C_in, H, W), dtype=jnp.float32)
    weight = jax.random.normal(k_w, (C_out, C_in, 3, 3), dtype=jnp.float32) * 0.1
    bias = jax.random.normal(k_b, (C_out,), dtype=jnp.float32) * 0.1
    gamma = jnp.ones((C_out,), dtype=jnp.float32)   # BatchNorm2d default weight
    beta = jnp.zeros((C_out,), dtype=jnp.float32)   # BatchNorm2d default bias

    fn = jax.jit(conv_bn_relu)
    out = jax.block_until_ready(fn(x, weight, bias, gamma, beta))

    ref = reference(x, weight, bias, gamma, beta)
    assert out.shape == (N, C_out, H, W)
    assert jnp.allclose(out, ref, rtol=1e-3, atol=1e-3), "mismatch vs reference"

    print("KERNEL_OK")
</pallas_src>

<mosaic_0001>
module attributes {stable_mosaic.version = 11 : i64} {
  func.func @bn_relu_kernel(%arg0: i32, %arg1: memref<288x128xf32, #tpu.memory_space<vmem>>, %arg2: memref<2x128xf32, #tpu.memory_space<vmem>>, %arg3: memref<1x128xf32, #tpu.memory_space<vmem>>, %arg4: memref<1x128xf32, #tpu.memory_space<vmem>>, %arg5: memref<288x128xf32, #tpu.memory_space<vmem>>) attributes {dimension_semantics = [#tpu.dimension_semantics<parallel>], iteration_bounds = array<i64: 2>, scalar_prefetch = 0 : i64, scratch_operands = 0 : i64, tpu.core_type = #tpu.core_type<tc>, window_params = [{transform_indices = @transform_0, window_bounds = array<i64: 288, 128>}, {pipeline_mode = #tpu.pipeline_mode<synchronous>, transform_indices = @transform_1, window_bounds = array<i64: 2, 128>}, {pipeline_mode = #tpu.pipeline_mode<synchronous>, transform_indices = @transform_2, window_bounds = array<i64: 1, 128>}, {pipeline_mode = #tpu.pipeline_mode<synchronous>, transform_indices = @transform_3, window_bounds = array<i64: 1, 128>}, {transform_indices = @transform_4, window_bounds = array<i64: 288, 128>}]} {
    %c0 = arith.constant 0 : index
    %c0_0 = arith.constant 0 : index
    %0 = vector.load %arg2[%c0, %c0_0] : memref<2x128xf32, #tpu.memory_space<vmem>>, vector<1x128xf32>
    %cst = arith.constant 0.001953125 : f32
    %1 = vector.broadcast %cst : f32 to vector<1x128xf32>
    %2 = arith.mulf %0, %1 : vector<1x128xf32>
    %c1 = arith.constant 1 : index
    %c0_1 = arith.constant 0 : index
    %3 = vector.load %arg2[%c1, %c0_1] : memref<2x128xf32, #tpu.memory_space<vmem>>, vector<1x128xf32>
    %cst_2 = arith.constant 0.001953125 : f32
    %4 = vector.broadcast %cst_2 : f32 to vector<1x128xf32>
    %5 = arith.mulf %3, %4 : vector<1x128xf32>
    %6 = arith.mulf %2, %2 : vector<1x128xf32>
    %7 = arith.subf %5, %6 : vector<1x128xf32>
    %c0_3 = arith.constant 0 : index
    %c0_4 = arith.constant 0 : index
    %8 = vector.load %arg3[%c0_3, %c0_4] : memref<1x128xf32, #tpu.memory_space<vmem>>, vector<1x128xf32>
    %cst_5 = arith.constant 9.99999974E-6 : f32
    %9 = vector.broadcast %cst_5 : f32 to vector<1x128xf32>
    %10 = arith.addf %7, %9 : vector<1x128xf32>
    %11 = math.rsqrt %10 : vector<1x128xf32>
    %12 = arith.mulf %8, %11 : vector<1x128xf32>
    %c0_6 = arith.constant 0 : index
    %c0_7 = arith.constant 0 : index
    %13 = vector.load %arg4[%c0_6, %c0_7] : memref<1x128xf32, #tpu.memory_space<vmem>>, vector<1x128xf32>
    %14 = arith.mulf %2, %12 : vector<1x128xf32>
    %15 = arith.subf %13, %14 : vector<1x128xf32>
    %c0_8 = arith.constant 0 : index
    %c0_9 = arith.constant 0 : index
    %16 = vector.load %arg1[%c0_8, %c0_9] : memref<288x128xf32, #tpu.memory_space<vmem>>, vector<288x128xf32>
    %17 = vector.broadcast %12 : vector<1x128xf32> to vector<288x128xf32>
    %18 = arith.mulf %16, %17 : vector<288x128xf32>
    %19 = vector.broadcast %15 : vector<1x128xf32> to vector<288x128xf32>
    %20 = arith.addf %18, %19 : vector<288x128xf32>
    %cst_10 = arith.constant 0.000000e+00 : f32
    %21 = vector.broadcast %cst_10 : f32 to vector<288x128xf32>
    %22 = arith.maximumf %20, %21 : vector<288x128xf32>
    %c0_11 = arith.constant 0 : index
    %c0_12 = arith.constant 0 : index
    %23 = vector.load %arg5[%c0_11, %c0_12] : memref<288x128xf32, #tpu.memory_space<vmem>>, vector<288x128xf32>
    tpu.vector_store %arg5[%c0_11, %c0_12], %22 {strides = array<i32>} : memref<288x128xf32, #tpu.memory_space<vmem>>, vector<288x128xf32>,
    return
  }
  func.func @transform_0(%arg0: i32) -> (i32, i32) {
    %c0_i32 = arith.constant 0 : i32
    %c0_i32_0 = arith.constant 0 : i32
    return %arg0, %c0_i32 : i32, i32
  }
  func.func @transform_1(%arg0: i32) -> (i32, i32) {
    %c0_i32 = arith.constant 0 : i32
    %c0_i32_0 = arith.constant 0 : i32
    %c0_i32_1 = arith.constant 0 : i32
    return %c0_i32, %c0_i32_0 : i32, i32
  }
  func.func @transform_2(%arg0: i32) -> (i32, i32) {
    %c0_i32 = arith.constant 0 : i32
    %c0_i32_0 = arith.constant 0 : i32
    %c0_i32_1 = arith.constant 0 : i32
    return %c0_i32, %c0_i32_0 : i32, i32
  }
  func.func @transform_3(%arg0: i32) -> (i32, i32) {
    %c0_i32 = arith.constant 0 : i32
    %c0_i32_0 = arith.constant 0 : i32
    %c0_i32_1 = arith.constant 0 : i32
    return %c0_i32, %c0_i32_0 : i32, i32
  }
  func.func @transform_4(%arg0: i32) -> (i32, i32) {
    %c0_i32 = arith.constant 0 : i32
    %c0_i32_0 = arith.constant 0 : i32
    return %arg0, %c0_i32 : i32, i32
  }
}

module attributes {stable_mosaic.version = 11 : i64} {
  func.func @conv_stats_kernel(%arg0: i32, %arg1: memref<1x326x4xf32, #tpu.memory_space<vmem>>, %arg2: memref<9x4x128xf32, #tpu.memory_space<vmem>>, %arg3: memref<1x128xf32, #tpu.memory_space<vmem>>, %arg4: memref<288x1xf32, #tpu.memory_space<vmem>>, %arg5: memref<288x128xf32, #tpu.memory_space<vmem>>, %arg6: memref<2x128xf32, #tpu.memory_space<vmem>>) attributes {dimension_semantics = [#tpu.dimension_semantics<arbitrary>], iteration_bounds = array<i64: 2>, scalar_prefetch = 0 : i64, scratch_operands = 0 : i64, tpu.core_type = #tpu.core_type<tc>, window_params = [{transform_indices = @transform_0, window_bounds = array<i64: 1, 326, 4>}, {pipeline_mode = #tpu.pipeline_mode<synchronous>, transform_indices = @transform_1, window_bounds = array<i64: 9, 4, 128>}, {pipeline_mode = #tpu.pipeline_mode<synchronous>, transform_indices = @transform_2, window_bounds = array<i64: 1, 128>}, {pipeline_mode = #tpu.pipeline_mode<synchronous>, transform_indices = @transform_3, window_bounds = array<i64: 288, 1>}, {transform_indices = @transform_4, window_bounds = array<i64: 288, 128>}, {pipeline_mode = #tpu.pipeline_mode<synchronous>, transform_indices = @transform_5, window_bounds = array<i64: 2, 128>}]} {
    %cst = arith.constant 0.000000e+00 : f32
    %0 = vector.broadcast %cst : f32 to vector<288x128xf32>
    %c0 = arith.constant 0 : index
    %c0_0 = arith.constant 0 : index
    %c0_1 = arith.constant 0 : index
    %1 = vector.load %arg1[%c0, %c0_0, %c0_1] : memref<1x326x4xf32, #tpu.memory_space<vmem>>, vector<1x288x4xf32>
    %2 = vector.shape_cast %1 : vector<1x288x4xf32> to vector<288x4xf32>
    %c0_2 = arith.constant 0 : index
    %c0_3 = arith.constant 0 : index
    %c0_4 = arith.constant 0 : index
    %3 = vector.load %arg2[%c0_2, %c0_3, %c0_4] : memref<9x4x128xf32, #tpu.memory_space<vmem>>, vector<1x4x128xf32>
    %4 = vector.shape_cast %3 : vector<1x4x128xf32> to vector<4x128xf32>
    %cst_5 = arith.constant dense<0.000000e+00> : vector<288x128xf32>
    %5 = tpu.matmul %2, %4, %cst_5 {dimension_numbers = #tpu.dot_dimension_numbers<[1], [0], [0], [1], [0, 0, 1, 1], [], []>} : vector<288x4xf32>, vector<4x128xf32>, vector<288x128xf32> -> vector<288x128xf32>
    %6 = arith.addf %0, %5 : vector<288x128xf32>
    %c0_6 = arith.constant 0 : index
    %c1 = arith.constant 1 : index
    %c0_7 = arith.constant 0 : index
    %7 = vector.load %arg1[%c0_6, %c1, %c0_7] : memref<1x326x4xf32, #tpu.memory_space<vmem>>, vector<1x288x4xf32>
    %8 = vector.shape_cast %7 : vector<1x288x4xf32> to vector<288x4xf32>
    %c1_8 = arith.constant 1 : index
    %c0_9 = arith.constant 0 : index
    %c0_10 = arith.constant 0 : index
    %9 = vector.load %arg2[%c1_8, %c0_9, %c0_10] : memref<9x4x128xf32, #tpu.memory_space<vmem>>, vector<1x4x128xf32>
    %10 = vector.shape_cast %9 : vector<1x4x128xf32> to vector<4x128xf32>
    %cst_11 = arith.constant dense<0.000000e+00> : vector<288x128xf32>
    %11 = tpu.matmul %8, %10, %cst_11 {dimension_numbers = #tpu.dot_dimension_numbers<[1], [0], [0], [1], [0, 0, 1, 1], [], []>} : vector<288x4xf32>, vector<4x128xf32>, vector<288x128xf32> -> vector<288x128xf32>
    %12 = arith.addf %6, %11 : vector<288x128xf32>
    %c0_12 = arith.constant 0 : index
    %c2 = arith.constant 2 : index
    %c0_13 = arith.constant 0 : index
    %13 = vector.load %arg1[%c0_12, %c2, %c0_13] : memref<1x326x4xf32, #tpu.memory_space<vmem>>, vector<1x288x4xf32>
    %14 = vector.shape_cast %13 : vector<1x288x4xf32> to vector<288x4xf32>
    %c2_14 = arith.constant 2 : index
    %c0_15 = arith.constant 0 : index
    %c0_16 = arith.constant 0 : index
    %15 = vector.load %arg2[%c2_14, %c0_15, %c0_16] : memref<9x4x128xf32, #tpu.memory_space<vmem>>, vector<1x4x128xf32>
    %16 = vector.shape_cast %15 : vector<1x4x128xf32> to vector<4x128xf32>
    %cst_17 = arith.constant dense<0.000000e+00> : vector<288x128xf32>
    %17 = tpu.matmul %14, %16, %cst_17 {dimension_numbers = #tpu.dot_dimension_numbers<[1], [0], [0], [1], [0, 0, 1, 1], [], []>} : vector<288x4xf32>, vector<4x128xf32>, vector<288x128xf32> -> vector<288x128xf32>
    %18 = arith.addf %12, %17 : vector<288x128xf32>
    %c0_18 = arith.constant 0 : index
    %c18 = arith.constant 18 : index
    %c0_19 = arith.constant 0 : index
    %19 = vector.load %arg1[%c0_18, %c18, %c0_19] : memref<1x326x4xf32, #tpu.memory_space<vmem>>, vector<1x288x4xf32>
    %20 = vector.shape_cast %19 : vector<1x288x4xf32> to vector<288x4xf32>
    %c3 = arith.constant 3 : index
    %c0_20 = arith.constant 0 : index
    %c0_21 = arith.constant 0 : index
    %21 = vector.load %arg2[%c3, %c0_20, %c0_21] : memref<9x4x128xf32, #tpu.memory_space<vmem>>, vector<1x4x128xf32>
    %22 = vector.shape_cast %21 : vector<1x4x128xf32> to vector<4x128xf32>
    %cst_22 = arith.constant dense<0.000000e+00> : vector<288x128xf32>
    %23 = tpu.matmul %20, %22, %cst_22 {dimension_numbers = #tpu.dot_dimension_numbers<[1], [0], [0], [1], [0, 0, 1, 1], [], []>} : vector<288x4xf32>, vector<4x128xf32>, vector<288x128xf32> -> vector<288x128xf32>
    %24 = arith.addf %18, %23 : vector<288x128xf32>
    %c0_23 = arith.constant 0 : index
    %c19 = arith.constant 19 : index
    %c0_24 = arith.constant 0 : index
    %25 = vector.load %arg1[%c0_23, %c19, %c0_24] : memref<1x326x4xf32, #tpu.memory_space<vmem>>, vector<1x288x4xf32>
    %26 = vector.shape_cast %25 : vector<1x288x4xf32> to vector<288x4xf32>
    %c4 = arith.constant 4 : index
    %c0_25 = arith.constant 0 : index
    %c0_26 = arith.constant 0 : index
    %27 = vector.load %arg2[%c4, %c0_25, %c0_26] : memref<9x4x128xf32, #tpu.memory_space<vmem>>, vector<1x4x128xf32>
    %28 = vector.shape_cast %27 : vector<1x4x128xf32> to vector<4x128xf32>
    %cst_27 = arith.constant dense<0.000000e+00> : vector<288x128xf32>
    %29 = tpu.matmul %26, %28, %cst_27 {dimension_numbers = #tpu.dot_dimension_numbers<[1], [0], [0], [1], [0, 0, 1, 1], [], []>} : vector<288x4xf32>, vector<4x128xf32>, vector<288x128xf32> -> vector<288x128xf32>
    %30 = arith.addf %24, %29 : vector<288x128xf32>
    %c0_28 = arith.constant 0 : index
    %c20 = arith.constant 20 : index
    %c0_29 = arith.constant 0 : index
    %31 = vector.load %arg1[%c0_28, %c20, %c0_29] : memref<1x326x4xf32, #tpu.memory_space<vmem>>, vector<1x288x4xf32>
    %32 = vector.shape_cast %31 : vector<1x288x4xf32> to vector<288x4xf32>
    %c5 = arith.constant 5 : index
    %c0_30 = arith.constant 0 : index
    %c0_31 = arith.constant 0 : index
    %33 = vector.load %arg2[%c5, %c0_30, %c0_31] : memref<9x4x128xf32, #tpu.memory_space<vmem>>, vector<1x4x128xf32>
    %34 = vector.shape_cast %33 : vector<1x4x128xf32> to vector<4x128xf32>
    %cst_32 = arith.constant dense<0.000000e+00> : vector<288x128xf32>
    %35 = tpu.matmul %32, %34, %cst_32 {dimension_numbers = #tpu.dot_dimension_numbers<[1], [0], [0], [1], [0, 0, 1, 1], [], []>} : vector<288x4xf32>, vector<4x128xf32>, vector<288x128xf32> -> vector<288x128xf32>
    %36 = arith.addf %30, %35 : vector<288x128xf32>
    %c0_33 = arith.constant 0 : index
    %c36 = arith.constant 36 : index
    %c0_34 = arith.constant 0 : index
    %37 = vector.load %arg1[%c0_33, %c36, %c0_34] : memref<1x326x4xf32, #tpu.memory_space<vmem>>, vector<1x288x4xf32>
    %38 = vector.shape_cast %37 : vector<1x288x4xf32> to vector<288x4xf32>
    %c6 = arith.constant 6 : index
    %c0_35 = arith.constant 0 : index
    %c0_36 = arith.constant 0 : index
    %39 = vector.load %arg2[%c6, %c0_35, %c0_36] : memref<9x4x128xf32, #tpu.memory_space<vmem>>, vector<1x4x128xf32>
    %40 = vector.shape_cast %39 : vector<1x4x128xf32> to vector<4x128xf32>
    %cst_37 = arith.constant dense<0.000000e+00> : vector<288x128xf32>
    %41 = tpu.matmul %38, %40, %cst_37 {dimension_numbers = #tpu.dot_dimension_numbers<[1], [0], [0], [1], [0, 0, 1, 1], [], []>} : vector<288x4xf32>, vector<4x128xf32>, vector<288x128xf32> -> vector<288x128xf32>
    %42 = arith.addf %36, %41 : vector<288x128xf32>
    %c0_38 = arith.constant 0 : index
    %c37 = arith.constant 37 : index
    %c0_39 = arith.constant 0 : index
    %43 = vector.load %arg1[%c0_38, %c37, %c0_39] : memref<1x326x4xf32, #tpu.memory_space<vmem>>, vector<1x288x4xf32>
    %44 = vector.shape_cast %43 : vector<1x288x4xf32> to vector<288x4xf32>
    %c7 = arith.constant 7 : index
    %c0_40 = arith.constant 0 : index
    %c0_41 = arith.constant 0 : index
    %45 = vector.load %arg2[%c7, %c0_40, %c0_41] : memref<9x4x128xf32, #tpu.memory_space<vmem>>, vector<1x4x128xf32>
    %46 = vector.shape_cast %45 : vector<1x4x128xf32> to vector<4x128xf32>
    %cst_42 = arith.constant dense<0.000000e+00> : vector<288x128xf32>
    %47 = tpu.matmul %44, %46, %cst_42 {dimension_numbers = #tpu.dot_dimension_numbers<[1], [0], [0], [1], [0, 0, 1, 1], [], []>} : vector<288x4xf32>, vector<4x128xf32>, vector<288x128xf32> -> vector<288x128xf32>
    %48 = arith.addf %42, %47 : vector<288x128xf32>
    %c0_43 = arith.constant 0 : index
    %c38 = arith.constant 38 : index
    %c0_44 = arith.constant 0 : index
    %49 = vector.load %arg1[%c0_43, %c38, %c0_44] : memref<1x326x4xf32, #tpu.memory_space<vmem>>, vector<1x288x4xf32>
    %50 = vector.shape_cast %49 : vector<1x288x4xf32> to vector<288x4xf32>
    %c8 = arith.constant 8 : index
    %c0_45 = arith.constant 0 : index
    %c0_46 = arith.constant 0 : index
    %51 = vector.load %arg2[%c8, %c0_45, %c0_46] : memref<9x4x128xf32, #tpu.memory_space<vmem>>, vector<1x4x128xf32>
    %52 = vector.shape_cast %51 : vector<1x4x128xf32> to vector<4x128xf32>
    %cst_47 = arith.constant dense<0.000000e+00> : vector<288x128xf32>
    %53 = tpu.matmul %50, %52, %cst_47 {dimension_numbers = #tpu.dot_dimension_numbers<[1], [0], [0], [1], [0, 0, 1, 1], [], []>} : vector<288x4xf32>, vector<4x128xf32>, vector<288x128xf32> -> vector<288x128xf32>
    %54 = arith.addf %48, %53 : vector<288x128xf32>
    %c0_48 = arith.constant 0 : index
    %c0_49 = arith.constant 0 : index
    %55 = vector.load %arg3[%c0_48, %c0_49] : memref<1x128xf32, #tpu.memory_space<vmem>>, vector<1x128xf32>
    %56 = vector.broadcast %55 : vector<1x128xf32> to vector<288x128xf32>
    %57 = arith.addf %54, %56 : vector<288x128xf32>
    %c0_50 = arith.constant 0 : index
    %c0_51 = arith.constant 0 : index
    %58 = vector.load %arg5[%c0_50, %c0_51] : memref<288x128xf32, #tpu.memory_space<vmem>>, vector<288x128xf32>
    tpu.vector_store %arg5[%c0_50, %c0_51], %57 {strides = array<i32>} : memref<288x128xf32, #tpu.memory_space<vmem>>, vector<288x128xf32>,
    %c0_52 = arith.constant 0 : index
    %c0_53 = arith.constant 0 : index
    %59 = vector.load %arg4[%c0_52, %c0_53] : memref<288x1xf32, #tpu.memory_space<vmem>>, vector<288x1xf32>
    %60 = vector.broadcast %59 : vector<288x1xf32> to vector<288x128xf32>
    %61 = arith.mulf %57, %60 : vector<288x128xf32>
    %cst_54 = arith.constant dense<0.000000e+00> : vector<128xf32>
    %62 = vector.multi_reduction <add>, %61, %cst_54 [0] : vector<288x128xf32> to vector<128xf32>
    %63 = vector.shape_cast %62 : vector<128xf32> to vector<1x128xf32>
    %64 = arith.mulf %61, %57 : vector<288x128xf32>
    %cst_55 = arith.constant dense<0.000000e+00> : vector<128xf32>
    %65 = vector.multi_reduction <add>, %64, %cst_55 [0] : vector<288x128xf32> to vector<128xf32>
    %66 = vector.shape_cast %65 : vector<128xf32> to vector<1x128xf32>
    %c0_i32 = arith.constant 0 : i32
    %67 = arith.cmpi eq, %arg0, %c0_i32 : i32
    %68 = arith.extui %67 : i1 to i32
    %c0_i32_56 = arith.constant 0 : i32
    %69 = arith.cmpi ne, %68, %c0_i32_56 : i32
    scf.if %69 {
      %cst_65 = arith.constant 0.000000e+00 : f32
      %76 = vector.broadcast %cst_65 : f32 to vector<2x128xf32>
      %c0_66 = arith.constant 0 : index
      %c0_67 = arith.constant 0 : index
      %77 = vector.load %arg6[%c0_66, %c0_67] : memref<2x128xf32, #tpu.memory_space<vmem>>, vector<2x128xf32>
      tpu.vector_store %arg6[%c0_66, %c0_67], %76 {strides = array<i32>} : memref<2x128xf32, #tpu.memory_space<vmem>>, vector<2x128xf32>,
    } else {
    }
    %c0_57 = arith.constant 0 : index
    %c0_58 = arith.constant 0 : index
    %70 = vector.load %arg6[%c0_57, %c0_58] : memref<2x128xf32, #tpu.memory_space<vmem>>, vector<1x128xf32>
    %71 = arith.addf %70, %63 : vector<1x128xf32>
    %c0_59 = arith.constant 0 : index
    %c0_60 = arith.constant 0 : index
    %72 = vector.load %arg6[%c0_59, %c0_60] : memref<2x128xf32, #tpu.memory_space<vmem>>, vector<1x128xf32>
    tpu.vector_store %arg6[%c0_59, %c0_60], %71 {strides = array<i32>} : memref<2x128xf32, #tpu.memory_space<vmem>>, vector<1x128xf32>,
    %c1_61 = arith.constant 1 : index
    %c0_62 = arith.constant 0 : index
    %73 = vector.load %arg6[%c1_61, %c0_62] : memref<2x128xf32, #tpu.memory_space<vmem>>, vector<1x128xf32>
    %74 = arith.addf %73, %66 : vector<1x128xf32>
    %c1_63 = arith.constant 1 : index
    %c0_64 = arith.constant 0 : index
    %75 = vector.load %arg6[%c1_63, %c0_64] : memref<2x128xf32, #tpu.memory_space<vmem>>, vector<1x128xf32>
    tpu.vector_store %arg6[%c1_63, %c0_64], %74 {strides = array<i32>} : memref<2x128xf32, #tpu.memory_space<vmem>>, vector<1x128xf32>,
    return
  }
  func.func @transform_0(%arg0: i32) -> (i32, i32, i32) {
    %c0_i32 = arith.constant 0 : i32
    %c0_i32_0 = arith.constant 0 : i32
    %c0_i32_1 = arith.constant 0 : i32
    return %arg0, %c0_i32, %c0_i32_0 : i32, i32, i32
  }
  func.func @transform_1(%arg0: i32) -> (i32, i32, i32) {
    %c0_i32 = arith.constant 0 : i32
    %c0_i32_0 = arith.constant 0 : i32
    %c0_i32_1 = arith.constant 0 : i32
    %c0_i32_2 = arith.constant 0 : i32
    return %c0_i32, %c0_i32_0, %c0_i32_1 : i32, i32, i32
  }
  func.func @transform_2(%arg0: i32) -> (i32, i32) {
    %c0_i32 = arith.constant 0 : i32
    %c0_i32_0 = arith.constant 0 : i32
    %c0_i32_1 = arith.constant 0 : i32
    return %c0_i32, %c0_i32_0 : i32, i32
  }
  func.func @transform_3(%arg0: i32) -> (i32, i32) {
    %c0_i32 = arith.constant 0 : i32
    %c0_i32_0 = arith.constant 0 : i32
    %c0_i32_1 = arith.constant 0 : i32
    return %c0_i32, %c0_i32_0 : i32, i32
  }
  func.func @transform_4(%arg0: i32) -> (i32, i32) {
    %c0_i32 = arith.constant 0 : i32
    %c0_i32_0 = arith.constant 0 : i32
    return %arg0, %c0_i32 : i32, i32
  }
  func.func @transform_5(%arg0: i32) -> (i32, i32) {
    %c0_i32 = arith.constant 0 : i32
    %c0_i32_0 = arith.constant 0 : i32
    %c0_i32_1 = arith.constant 0 : i32
    return %c0_i32, %c0_i32_0 : i32, i32
  }
}

</mosaic_0001>

<bundles_post_ra>
// kernel: conv_bn_relu.3
= control target key start
LH: loop header
LB: loop body
LE: loop exit
PB: predicated region body
PF: predicated region fallthrough
CT: control target
= control target key end

     0   :  { %s514_s15 = smov 0   ;;  %s702_s0 = inlined_call_operand.vmem [shape: f32[576,128], index: 0, kind: input, shape index: {}]   ;;  %s703_s1 = inlined_call_operand.vmem [shape: f32[2,128], index: 1, kind: input, shape index: {}]   ;;  %s704_s2 = inlined_call_operand.vmem [shape: f32[1,128], index: 2, kind: input, shape index: {}]   ;;  %s705_s3 = inlined_call_operand.vmem [shape: f32[1,128], index: 3, kind: input, shape index: {}]   ;;  %s706_s4 = inlined_call_operand.vmem [shape: f32[576,128], index: 4, kind: output, shape index: {}]  }
   0x1 LB: > { %s462_s16 = sadd.s32 4294967295, %s487_s15   ;;  %p466_p0 = scmp.ge.s32.totalorder %s487_s15, 1  ;;  %s487_s15 = sphi %s514_s15, %s14_s15  }
   0x2   : > { %p163_p1 = scmp.lt.s32.totalorder %s487_s15, 3 }
   0x4   : > { %p164_p2 = pnand %p466_p0, %p163_p1 }
   0x5   : > { %v201_v0 = vld [vmem:[%s703_s1] sm:$0x1] (!%p164_p2)  ;;  %v203_v1 = vld [vmem:[%s703_s1 + $0x1] sm:$0x1] (!%p164_p2)  ;;  %s189_s21 = smul.u32 (!%p164_p2), 36, %s462_s16  ;;  %v251_v7 = vlaneseq (!%p164_p2) }
   0x6   : > { %167 = sbr.rel (%p164_p2) target bundleno = 62 (0x3e), region = 36  ;;  %v202_v2 = vmul.f32 (!%p164_p2), 0.001953125, %v201_v0  ;;  %v204_v3 = vmul.f32 (!%p164_p2), 0.001953125, %v203_v1  ;;  %v207_v9 = vld [vmem:[%s704_s2] sm:$0x1] (!%p164_p2) }
   0x7   : > { %p190_p3 = scmp.lt.s32.totalorder (!%p164_p2), %s189_s21, 71  ;;  %v252_v8 = vshrl.u32 (!%p164_p2), %v251_v7, 7  ;;  %v211_v13 = vld [vmem:[%s705_s3] sm:$0x1] (!%p164_p2) }
   0x8   : > { %v205_v4 = vmul.f32 (!%p164_p2), %v202_v2, %v202_v2 }
   0x9   : > { %v253_v10 = vsub.s32 (!%p164_p2), 0, %v252_v8 }
   0xa   : > { %v206_v5 = vsub.f32 (!%p164_p2), %v204_v3, %v205_v4 }
   0xc   : > { %v208_v6 = vadd.f32 (!%p164_p2), 1e-05, %v206_v5 }
   0xd   : > { %s708_s21 = smov (!%p190_p3, %s189_s21), 71 }
   0xe   : > { %479 = vrsqrt.f32 %v208_v6  ;;  %s467_s22 = sshll.u32 %s708_s21, 3 }
   0xf   : > { %s536_s25 = scalar_lea.vmem %s702_s0, %s467_s22  ;;  %s585_s6 = scalar_lea.vmem %s706_s4, %s467_s22 }
  0x10   : > { %v214_v14 = vld [vmem:[%s536_s25] sm:$0xff]  ;;  %v215_v15 = vld [vmem:[%s536_s25 + $0x8] sm:$0xff]  ;;  %v216_v16 = vld [vmem:[%s536_s25 + $0x10] sm:$0xff] }
  0x11   : > { %v217_v17 = vld [vmem:[%s536_s25 + $0x18] sm:$0xff]  ;;  %v218_v18 = vld [vmem:[%s536_s25 + $0x20] sm:$0xff]  ;;  %v219_v21 = vld [vmem:[%s536_s25 + $0x28] sm:$0xff] }
  0x12   : > { %v220_v22 = vld [vmem:[%s536_s25 + $0x30] sm:$0xff]  ;;  %v221_v23 = vld [vmem:[%s536_s25 + $0x38] sm:$0xff]  ;;  %v222_v24 = vld [vmem:[%s536_s25 + $0x40] sm:$0xff] }
  0x13   : > { %v223_v25 = vld [vmem:[%s536_s25 + $0x48] sm:$0xff]  ;;  %v224_v26 = vld [vmem:[%s536_s25 + $0x50] sm:$0xff]  ;;  %v225_v31 = vld [vmem:[%s536_s25 + $0x58] sm:$0xff] }
  0x14   : > { %v226_v32 = vld [vmem:[%s536_s25 + $0x60] sm:$0xff]  ;;  %v227_v33 = vld [vmem:[%s536_s25 + $0x68] sm:$0xff]  ;;  %v228_v58 = vld [vmem:[%s536_s25 + $0x70] sm:$0xff] }
  0x15   : > { %v229_v59 = vld [vmem:[%s536_s25 + $0x78] sm:$0xff]  ;;  %v230_v4 = vld [vmem:[%s536_s25 + $0x80] sm:$0xff] }
  0x18   : > { %v480_v11 = vpop.eup %479 }
  0x19   : > { %v210_v12 = vmul.f32 %v480_v11, %v207_v9  ;;  %v231_v9 = vld [vmem:[%s536_s25 + $0x88] sm:$0xff]  ;;  %v233_v11 = vld [vmem:[%s536_s25 + $0x98] sm:$0xff] }
  0x1b   : > { %v212_v19 = vmul.f32 %v210_v12, %v202_v2  ;;  %v549_v20 = vrot.slane %v210_v12, %v253_v10 }
  0x1d   : > { %v213_v27 = vsub.f32 %v211_v13, %v212_v19  ;;  %v256_v28 = vmul.f32 %v549_v20, %v214_v14  ;;  %v257_v29 = vmul.f32 %v549_v20, %v215_v15  ;;  %v258_v30 = vmul.f32 %v549_v20, %v216_v16  ;;  %v234_v16 = vld [vmem:[%s536_s25 + $0xa0] sm:$0xff] }
  0x1e   : > { %v259_v34 = vmul.f32 %v549_v20, %v217_v17  ;;  %v260_v35 = vmul.f32 %v549_v20, %v218_v18  ;;  %v261_v36 = vmul.f32 %v549_v20, %v219_v21  ;;  %v262_v37 = vmul.f32 %v549_v20, %v220_v22  ;;  %v235_v17 = vld [vmem:[%s536_s25 + $0xa8] sm:$0xff] }
  0x1f   : > { %v567_v38 = vrot.slane %v213_v27, %v253_v10  ;;  %v263_v39 = vmul.f32 %v549_v20, %v221_v23  ;;  %v264_v40 = vmul.f32 %v549_v20, %v222_v24  ;;  %v265_v41 = vmul.f32 %v549_v20, %v223_v25  ;;  %v232_v10 = vld [vmem:[%s536_s25 + $0x90] sm:$0xff] }
  0x20   : > { %v266_v42 = vmul.f32 %v549_v20, %v224_v26  ;;  %v267_v43 = vmul.f32 %v549_v20, %v225_v31  ;;  %v268_v44 = vmul.f32 %v549_v20, %v226_v32  ;;  %v269_v45 = vmul.f32 %v549_v20, %v227_v33  ;;  %v236_v27 = vld [vmem:[%s536_s25 + $0xb0] sm:$0xff] }
  0x21   : > { %v298_v46 = vadd.f32 %v567_v38, %v256_v28  ;;  %v299_v47 = vadd.f32 %v567_v38, %v257_v29  ;;  %v300_v48 = vadd.f32 %v567_v38, %v258_v30  ;;  %v301_v49 = vadd.f32 %v567_v38, %v259_v34  ;;  %v237_v28 = vld [vmem:[%s536_s25 + $0xb8] sm:$0xff] }
  0x22   : > { %v302_v50 = vadd.f32 %v567_v38, %v260_v35  ;;  %v303_v51 = vadd.f32 %v567_v38, %v261_v36  ;;  %v304_v52 = vadd.f32 %v567_v38, %v262_v37  ;;  %v305_v53 = vadd.f32 %v567_v38, %v263_v39  ;;  %v238_v37 = vld [vmem:[%s536_s25 + $0xc0] sm:$0xff] }
  0x23   : > { %v334_v54 = vmax.f32 %v298_v46, 0.0  ;;  %v335_v55 = vmax.f32 %v299_v47, 0.0  ;;  %v336_v56 = vmax.f32 %v300_v48, 0.0  ;;  %v337_v57 = vmax.f32 %v301_v49, 0.0 }
  0x24   : > { %v338_v60 = vmax.f32 %v302_v50, 0.0  ;;  %v339_v61 = vmax.f32 %v303_v51, 0.0  ;;  %v340_v62 = vmax.f32 %v304_v52, 0.0  ;;  %v341_v63 = vmax.f32 %v305_v53, 0.0  ;;  %v242_v50 = vld [vmem:[%s536_s25 + $0xe0] sm:$0xff]  ;;  %v243_v51 = vld [vmem:[%s536_s25 + $0xe8] sm:$0xff] }
  0x25   : > { %370 = vst [vmem:[%s585_s6] sm:$0xff] %v334_v54  ;;  %371 = vst [vmem:[%s585_s6 + $0x8] sm:$0xff] %v335_v55  ;;  %v306_v0 = vadd.f32 %v567_v38, %v264_v40  ;;  %v307_v1 = vadd.f32 %v567_v38, %v265_v41  ;;  %v308_v2 = vadd.f32 %v567_v38, %v266_v42 }
  0x26   : > { %372 = vst [vmem:[%s585_s6 + $0x10] sm:$0xff] %v336_v56  ;;  %373 = vst [vmem:[%s585_s6 + $0x18] sm:$0xff] %v337_v57  ;;  %v309_v3 = vadd.f32 %v567_v38, %v267_v43  ;;  %v310_v5 = vadd.f32 %v567_v38, %v268_v44  ;;  %v311_v6 = vadd.f32 %v567_v38, %v269_v45  ;;  %v239_v43 = vld [vmem:[%s536_s25 + $0xc8] sm:$0xff]  ;;  %v240_v44 = vld [vmem:[%s536_s25 + $0xd0] sm:$0xff] }
  0x27   : > { %374 = vst [vmem:[%s585_s6 + $0x20] sm:$0xff] %v338_v60  ;;  %375 = vst [vmem:[%s585_s6 + $0x28] sm:$0xff] %v339_v61  ;;  %v270_v7 = vmul.f32 %v549_v20, %v228_v58  ;;  %v271_v8 = vmul.f32 %v549_v20, %v229_v59  ;;  %v342_v12 = vmax.f32 %v306_v0, 0.0  ;;  %v343_v13 = vmax.f32 %v307_v1, 0.0  ;;  %v241_v45 = vld [vmem:[%s536_s25 + $0xd8] sm:$0xff]  ;;  %v244_v60 = vld [vmem:[%s536_s25 + $0xf0] sm:$0xff] }
  0x28   : > { %376 = vst [vmem:[%s585_s6 + $0x30] sm:$0xff] %v340_v62  ;;  %377 = vst [vmem:[%s585_s6 + $0x38] sm:$0xff] %v341_v63  ;;  %v344_v14 = vmax.f32 %v308_v2, 0.0  ;;  %v345_v15 = vmax.f32 %v309_v3, 0.0  ;;  %v346_v18 = vmax.f32 %v310_v5, 0.0  ;;  %v347_v19 = vmax.f32 %v311_v6, 0.0 }
  0x29   : > { %v312_v21 = vadd.f32 %v567_v38, %v270_v7  ;;  %v313_v22 = vadd.f32 %v567_v38, %v271_v8  ;;  %378 = vst [vmem:[%s585_s6 + $0x40] sm:$0xff] %v342_v12  ;;  %379 = vst [vmem:[%s585_s6 + $0x48] sm:$0xff] %v343_v13  ;;  %v272_v23 = vmul.f32 %v549_v20, %v230_v4  ;;  %v245_v61 = vld [vmem:[%s536_s25 + $0xf8] sm:$0xff]  ;;  %v246_v6 = vld [vmem:[%s536_s25 + $0x100] sm:$0xff] }
  0x2a   : > { %380 = vst [vmem:[%s585_s6 + $0x50] sm:$0xff] %v344_v14  ;;  %381 = vst [vmem:[%s585_s6 + $0x58] sm:$0xff] %v345_v15  ;;  %v273_v24 = vmul.f32 %v549_v20, %v231_v9  ;;  %v274_v25 = vmul.f32 %v549_v20, %v232_v10  ;;  %v275_v26 = vmul.f32 %v549_v20, %v233_v11  ;;  %v247_v11 = vld [vmem:[%s536_s25 + $0x108] sm:$0xff]  ;;  %v248_v12 = vld [vmem:[%s536_s25 + $0x110] sm:$0xff] }
  0x2b   : > { %382 = vst [vmem:[%s585_s6 + $0x60] sm:$0xff] %v346_v18  ;;  %383 = vst [vmem:[%s585_s6 + $0x68] sm:$0xff] %v347_v19  ;;  %v348_v29 = vmax.f32 %v312_v21, 0.0  ;;  %v349_v30 = vmax.f32 %v313_v22, 0.0  ;;  %v276_v31 = vmul.f32 %v549_v20, %v234_v16  ;;  %v277_v32 = vmul.f32 %v549_v20, %v235_v17  ;;  %v249_v13 = vld [vmem:[%s536_s25 + $0x118] sm:$0xff] }
  0x2c   : > { %v314_v33 = vadd.f32 %v567_v38, %v272_v23  ;;  %v315_v34 = vadd.f32 %v567_v38, %v273_v24  ;;  %v316_v35 = vadd.f32 %v567_v38, %v274_v25  ;;  %v317_v36 = vadd.f32 %v567_v38, %v275_v26 }
  0x2d   : > { %384 = vst [vmem:[%s585_s6 + $0x70] sm:$0xff] %v348_v29  ;;  %385 = vst [vmem:[%s585_s6 + $0x78] sm:$0xff] %v349_v30  ;;  %v318_v39 = vadd.f32 %v567_v38, %v276_v31  ;;  %v319_v40 = vadd.f32 %v567_v38, %v277_v32  ;;  %v278_v41 = vmul.f32 %v549_v20, %v236_v27 }
  0x2e   : > { %v279_v42 = vmul.f32 %v549_v20, %v237_v28  ;;  %v350_v46 = vmax.f32 %v314_v33, 0.0  ;;  %v351_v47 = vmax.f32 %v315_v34, 0.0  ;;  %v352_v48 = vmax.f32 %v316_v35, 0.0 }
  0x2f   : > { %v353_v49 = vmax.f32 %v317_v36, 0.0  ;;  %v354_v52 = vmax.f32 %v318_v39, 0.0  ;;  %v355_v53 = vmax.f32 %v319_v40, 0.0  ;;  %v320_v54 = vadd.f32 %v567_v38, %v278_v41 }
  0x30   : > { %v321_v55 = vadd.f32 %v567_v38, %v279_v42  ;;  %386 = vst [vmem:[%s585_s6 + $0x80] sm:$0xff] %v350_v46  ;;  %387 = vst [vmem:[%s585_s6 + $0x88] sm:$0xff] %v351_v47  ;;  %v280_v56 = vmul.f32 %v549_v20, %v238_v37  ;;  %v281_v57 = vmul.f32 %v549_v20, %v239_v43 }
  0x31   : > { %388 = vst [vmem:[%s585_s6 + $0x90] sm:$0xff] %v352_v48  ;;  %389 = vst [vmem:[%s585_s6 + $0x98] sm:$0xff] %v353_v49  ;;  %v282_v58 = vmul.f32 %v549_v20, %v240_v44  ;;  %v283_v59 = vmul.f32 %v549_v20, %v241_v45  ;;  %v356_v62 = vmax.f32 %v320_v54, 0.0  ;;  %v284_v0 = vmul.f32 %v549_v20, %v242_v50 }
  0x32   : > { %390 = vst [vmem:[%s585_s6 + $0xa0] sm:$0xff] %v354_v52  ;;  %391 = vst [vmem:[%s585_s6 + $0xa8] sm:$0xff] %v355_v53  ;;  %v357_v63 = vmax.f32 %v321_v55, 0.0  ;;  %v285_v1 = vmul.f32 %v549_v20, %v243_v51  ;;  %v322_v2 = vadd.f32 %v567_v38, %v280_v56  ;;  %v323_v3 = vadd.f32 %v567_v38, %v281_v57 }
  0x33   : > { %v324_v4 = vadd.f32 %v567_v38, %v282_v58  ;;  %v325_v5 = vadd.f32 %v567_v38, %v283_v59  ;;  %392 = vst [vmem:[%s585_s6 + $0xb0] sm:$0xff] %v356_v62  ;;  %v326_v7 = vadd.f32 %v567_v38, %v284_v0  ;;  %v286_v9 = vmul.f32 %v549_v20, %v244_v60 }
  0x34   : > { %393 = vst [vmem:[%s585_s6 + $0xb8] sm:$0xff] %v357_v63  ;;  %v327_v8 = vadd.f32 %v567_v38, %v285_v1  ;;  %v287_v10 = vmul.f32 %v549_v20, %v245_v61  ;;  %v358_v14 = vmax.f32 %v322_v2, 0.0  ;;  %v359_v15 = vmax.f32 %v323_v3, 0.0 }
  0x35   : > { %v360_v16 = vmax.f32 %v324_v4, 0.0  ;;  %v361_v17 = vmax.f32 %v325_v5, 0.0  ;;  %v362_v18 = vmax.f32 %v326_v7, 0.0  ;;  %v328_v21 = vadd.f32 %v567_v38, %v286_v9 }
  0x36   : > { %v363_v19 = vmax.f32 %v327_v8, 0.0  ;;  %v329_v22 = vadd.f32 %v567_v38, %v287_v10  ;;  %394 = vst [vmem:[%s585_s6 + $0xc0] sm:$0xff] %v358_v14  ;;  %395 = vst [vmem:[%s585_s6 + $0xc8] sm:$0xff] %v359_v15  ;;  %v288_v23 = vmul.f32 %v549_v20, %v246_v6  ;;  %v289_v24 = vmul.f32 %v549_v20, %v247_v11 }
  0x37   : > { %396 = vst [vmem:[%s585_s6 + $0xd0] sm:$0xff] %v360_v16  ;;  %397 = vst [vmem:[%s585_s6 + $0xd8] sm:$0xff] %v361_v17  ;;  %v290_v25 = vmul.f32 %v549_v20, %v248_v12  ;;  %v291_v26 = vmul.f32 %v549_v20, %v249_v13  ;;  %v364_v27 = vmax.f32 %v328_v21, 0.0 }
  0x38   : > { %398 = vst [vmem:[%s585_s6 + $0xe0] sm:$0xff] %v362_v18  ;;  %399 = vst [vmem:[%s585_s6 + $0xe8] sm:$0xff] %v363_v19  ;;  %v365_v28 = vmax.f32 %v329_v22, 0.0  ;;  %v330_v29 = vadd.f32 %v567_v38, %v288_v23  ;;  %v331_v30 = vadd.f32 %v567_v38, %v289_v24 }
  0x39   : > { %v332_v31 = vadd.f32 %v567_v38, %v290_v25  ;;  %v333_v32 = vadd.f32 %v567_v38, %v291_v26  ;;  %400 = vst [vmem:[%s585_s6 + $0xf0] sm:$0xff] %v364_v27 }
  0x3a   : > { %401 = vst [vmem:[%s585_s6 + $0xf8] sm:$0xff] %v365_v28  ;;  %v366_v33 = vmax.f32 %v330_v29, 0.0  ;;  %v367_v34 = vmax.f32 %v331_v30, 0.0 }
  0x3b   : > { %v368_v20 = vmax.f32 %v332_v31, 0.0  ;;  %v369_v35 = vmax.f32 %v333_v32, 0.0 }
  0x3c   : > { %402 = vst [vmem:[%s585_s6 + $0x100] sm:$0xff] %v366_v33  ;;  %403 = vst [vmem:[%s585_s6 + $0x108] sm:$0xff] %v367_v34 }
  0x3d   : > { %404 = vst [vmem:[%s585_s6 + $0x110] sm:$0xff] %v368_v20  ;;  %405 = vst [vmem:[%s585_s6 + $0x118] sm:$0xff] %v369_v35 }
  0x3e PF: > { %s14_s15 = sadd.s32 1, %s487_s15  }
  0x3f   : > { %p11_p4 = scmp.ge.s32.totalorder %s14_s15, 4  }
  0x41   :  { %13 = sbr.rel (!%p11_p4) target bundleno = 1 (0x1), region = 66 }

// kernel: conv_bn_relu.2
= control target key start
LH: loop header
LB: loop body
LE: loop exit
PB: predicated region body
PF: predicated region fallthrough
CT: control target
= control target key end

     0   :  { %s6078_s18 = smov 0   ;;  %s7343_s0 = inlined_call_operand.vmem [shape: f32[2,326,4], index: 0, kind: input, shape index: {}]   ;;  %s7344_s1 = inlined_call_operand.vmem [shape: f32[9,4,128], index: 1, kind: input, shape index: {}]   ;;  %s7345_s2 = inlined_call_operand.vmem [shape: f32[1,128], index: 2, kind: input, shape index: {}]   ;;  %s7346_s3 = inlined_call_operand.vmem [shape: f32[288,1], index: 3, kind: input, shape index: {}]   ;;  %s7347_s4 = inlined_call_operand.vmem [shape: f32[576,128], index: 4, kind: output, shape index: {0}]   ;;  %s7348_s5 = inlined_call_operand.vmem [shape: f32[2,128], index: 5, kind: output, shape index: {1}]  }
   0x1 LB: > { %s6084_s19 = sadd.s32 4294967295, %s6044_s18   ;;  %p4549_p0 = scmp.ge.s32.totalorder %s6044_s18, 1  ;;  %s6044_s18 = sphi %s6078_s18, %s16_s18  }
   0x2   : > { %p185_p1 = scmp.lt.s32.totalorder %s6044_s18, 3 }
   0x4   : > { %p186_p2 = pnand %p4549_p0, %p185_p1 }
   0x5   : > { %v4552_v0 = vld [vmem:[%s7344_s1 + $0x4] sm:$0xf] (!%p186_p2)  ;;  %vm408_vm0 = vcmask (!%p186_p2), 1043456   ;;  %v6094_v1 = vld [vmem:[%s7344_s1 + $0x10] sm:$0xf] (!%p186_p2)  ;;  %p213_p3 = scmp.lt.s32.totalorder (!%p186_p2), %s6084_s19, 1 }
   0x6   : > { %189 = sbr.rel (%p186_p2) target bundleno = 580 (0x244), region = 36  ;;  %5230 = vmatprep.subr.msk.mxu1 (!%p186_p2), %vm408_vm0, %v4552_v0  ;;  %5454 = vmatprep.subr.msk.mxu0 (!%p186_p2), %vm408_vm0, %v6094_v1  ;;  %v260_v2 = vld [vmem:[%s7344_s1] sm:$0xf] (!%p186_p2)  ;;  %v4741_v3 = vld [vmem:[%s7344_s1 + $0x14] sm:$0xf] (!%p186_p2)  ;;  %vm299_vm1 = vcmask (!%p186_p2), 31744  }
   0x7   : > { %5231 = vmatpush3.msk.msra.mxu1 (!%p186_p2), %vm408_vm0, %v4552_v0  ;;  %5455 = vmatpush3.msk.msra.mxu0 (!%p186_p2), %vm408_vm0, %v6094_v1  ;;  %v6130_v10 = vld [vmem:[%s7344_s1 + $0x18] sm:$0xf] (!%p186_p2)  ;;  %v6135_v11 = vld [vmem:[%s7344_s1 + $0x8] sm:$0xf] (!%p186_p2)  ;;  %v6218_v48 = vld [vmem:[%s7344_s1 + $0x1c] sm:$0xf] (!%p186_p2) }
   0x8   : > { %5286 = vmatprep.subr.msk.mxu1 (!%p186_p2), %vm408_vm0, %v260_v2  ;;  %5510 = vmatprep.subr.msk.mxu0 (!%p186_p2), %vm408_vm0, %v4741_v3  ;;  %p4894_p5 = scmp.ne.s32.totalorder (!%p186_p2), %s6084_s19, 0 }
   0xd   : > { %s214_s28 = scalar_select %p213_p3, %s6084_s19, 1 }
   0xf   : > { %s6024_s29 = smul.u32 328, %s214_s28 }
  0x11   : > { %s6115_s7 = scalar_lea.vmem %s7343_s0, %s6024_s29 }
  0x12   : > { %v261_v4 = vld [vmem:[%s6115_s7 + $0x1] sm:$0xff]  ;;  %v1873_v5 = vld [vmem:[%s6115_s7 + $0x13] sm:$0xff]  ;;  %v262_v6 = vld [vmem:[%s6115_s7 + $0x9] sm:$0xff] }
  0x13   : > { %5232 = vmatprep.mubr.msk.f32.mxu1 %vm299_vm1, %v261_v4  ;;  %5456 = vmatprep.mubr.msk.f32.mxu0 %vm299_vm1, %v1873_v5  ;;  %v1874_v7 = vld [vmem:[%s6115_s7 + $0x1b] sm:$0xff]  ;;  %v263_v8 = vld [vmem:[%s6115_s7 + $0x11] sm:$0xff]  ;;  %v1875_v9 = vld [vmem:[%s6115_s7 + $0x23] sm:$0xff] }
  0x14   : > { %5233 = vmatmul.mubr.msk.f32.vlgmr.msra.gmra.mrb[0].mxu1 %vm299_vm1, %v262_v6  ;;  %5457 = vmatmul.mubr.msk.f32.vlgmr.msra.gmra.mrb[0].mxu0 %vm299_vm1, %v1874_v7  ;;  %v264_v12 = vld [vmem:[%s6115_s7 + $0x19] sm:$0xff]  ;;  %v1876_v13 = vld [vmem:[%s6115_s7 + $0x2b] sm:$0xff]  ;;  %v265_v14 = vld [vmem:[%s6115_s7 + $0x21] sm:$0xff] }
  0x15   : > { %5287 = vmatpush3.msk.msra.mxu1 %vm408_vm0, %v260_v2  ;;  %5511 = vmatpush3.msk.msra.mxu0 %vm408_vm0, %v4741_v3  ;;  %v1877_v15 = vld [vmem:[%s6115_s7 + $0x33] sm:$0xff]  ;;  %v266_v16 = vld [vmem:[%s6115_s7 + $0x29] sm:$0xff]  ;;  %v1878_v17 = vld [vmem:[%s6115_s7 + $0x3b] sm:$0xff] }
  0x16   : > { %5235 = vmatprep.mubr.msk.f32.mxu1 %vm299_vm1, %v263_v8  ;;  %5459 = vmatprep.mubr.msk.f32.mxu0 %vm299_vm1, %v1875_v9  ;;  %v267_v18 = vld [vmem:[%s6115_s7 + $0x31] sm:$0xff]  ;;  %v1879_v19 = vld [vmem:[%s6115_s7 + $0x43] sm:$0xff]  ;;  %v268_v20 = vld [vmem:[%s6115_s7 + $0x39] sm:$0xff] }
  0x17   : > { %5566 = vmatprep.subr.msk.mxu0 %vm408_vm0, %v6130_v10  ;;  %5342 = vmatprep.subr.msk.mxu1 %vm408_vm0, %v6135_v11  ;;  %v1880_v21 = vld [vmem:[%s6115_s7 + $0x4b] sm:$0xff]  ;;  %v269_v22 = vld [vmem:[%s6115_s7 + $0x41] sm:$0xff]  ;;  %v1881_v23 = vld [vmem:[%s6115_s7 + $0x53] sm:$0xff] }
  0x18   : > { %5236 = vmatmul.mubr.msk.f32.gmra.mrb[2].mxu1 %vm299_vm1, %v264_v12  ;;  %5460 = vmatmul.mubr.msk.f32.gmra.mrb[2].mxu0 %vm299_vm1, %v1876_v13  ;;  %v270_v24 = vld [vmem:[%s6115_s7 + $0x49] sm:$0xff]  ;;  %v1882_v25 = vld [vmem:[%s6115_s7 + $0x5b] sm:$0xff]  ;;  %v271_v26 = vld [vmem:[%s6115_s7 + $0x51] sm:$0xff] }
  0x19   : > { %5238 = vmatprep.mubr.msk.f32.mxu1 %vm299_vm1, %v265_v14  ;;  %5462 = vmatprep.mubr.msk.f32.mxu0 %vm299_vm1, %v1877_v15  ;;  %v1883_v27 = vld [vmem:[%s6115_s7 + $0x63] sm:$0xff]  ;;  %v272_v28 = vld [vmem:[%s6115_s7 + $0x59] sm:$0xff]  ;;  %v1884_v29 = vld [vmem:[%s6115_s7 + $0x6b] sm:$0xff] }
  0x1a   : > { %v273_v30 = vld [vmem:[%s6115_s7 + $0x61] sm:$0xff]  ;;  %v1885_v31 = vld [vmem:[%s6115_s7 + $0x73] sm:$0xff]  ;;  %v274_v32 = vld [vmem:[%s6115_s7 + $0x69] sm:$0xff] }
  0x1b   : > { %v1886_v33 = vld [vmem:[%s6115_s7 + $0x7b] sm:$0xff]  ;;  %v275_v34 = vld [vmem:[%s6115_s7 + $0x71] sm:$0xff]  ;;  %v1887_v35 = vld [vmem:[%s6115_s7 + $0x83] sm:$0xff] }
  0x1c   : > { %5239 = vmatmul.mubr.msk.f32.gmra.mrb[4].mxu1 %vm299_vm1, %v266_v16  ;;  %5463 = vmatmul.mubr.msk.f32.gmra.mrb[4].mxu0 %vm299_vm1, %v1878_v17  ;;  %v276_v36 = vld [vmem:[%s6115_s7 + $0x79] sm:$0xff]  ;;  %v1888_v37 = vld [vmem:[%s6115_s7 + $0x8b] sm:$0xff]  ;;  %v277_v38 = vld [vmem:[%s6115_s7 + $0x81] sm:$0xff] }
  0x1d   : > { %5241 = vmatprep.mubr.msk.f32.mxu1 %vm299_vm1, %v267_v18  ;;  %5465 = vmatprep.mubr.msk.f32.mxu0 %vm299_vm1, %v1879_v19  ;;  %v1889_v39 = vld [vmem:[%s6115_s7 + $0x93] sm:$0xff]  ;;  %v278_v40 = vld [vmem:[%s6115_s7 + $0x89] sm:$0xff]  ;;  %v1890_v41 = vld [vmem:[%s6115_s7 + $0x9b] sm:$0xff] }
  0x1e   : > { %v279_v42 = vld [vmem:[%s6115_s7 + $0x91] sm:$0xff]  ;;  %v280_v44 = vld [vmem:[%s6115_s7 + $0x99] sm:$0xff]  ;;  %v281_v46 = vld [vmem:[%s6115_s7 + $0xa1] sm:$0xff] }
  0x1f   : > { %v2303_v43 = vld [vmem:[%s6115_s7 + $0x14] sm:$0xff]  ;;  %v2304_v45 = vld [vmem:[%s6115_s7 + $0x1c] sm:$0xff]  ;;  %v6213_v47 = vld [vmem:[%s6115_s7 + $0x24] sm:$0xff] }
  0x20   : > { %5242 = vmatmul.mubr.msk.f32.gmra.mrb[6].mxu1 %vm299_vm1, %v268_v20  ;;  %5466 = vmatmul.mubr.msk.f32.gmra.mrb[6].mxu0 %vm299_vm1, %v1880_v21  ;;  %v282_v49 = vld [vmem:[%s6115_s7 + $0xa9] sm:$0xff]  ;;  %v283_v51 = vld [vmem:[%s6115_s7 + $0xb1] sm:$0xff]  ;;  %v284_v53 = vld [vmem:[%s6115_s7 + $0xb9] sm:$0xff] }
  0x21   : > { %5244 = vmatprep.mubr.msk.f32.mxu1 %vm299_vm1, %v269_v22  ;;  %5468 = vmatprep.mubr.msk.f32.mxu0 %vm299_vm1, %v1881_v23  ;;  %v6227_v50 = vld [vmem:[%s6115_s7 + $0x2c] sm:$0xff]  ;;  %v6233_v52 = vld [vmem:[%s6115_s7 + $0x34] sm:$0xff]  ;;  %v6245_v54 = vld [vmem:[%s6115_s7 + $0x3c] sm:$0xff] }
  0x22   : > { %v285_v55 = vld [vmem:[%s6115_s7 + $0xc1] sm:$0xff]  ;;  %v286_v57 = vld [vmem:[%s6115_s7 + $0xc9] sm:$0xff]  ;;  %v287_v59 = vld [vmem:[%s6115_s7 + $0xd1] sm:$0xff] }
  0x23   : > { %v6249_v56 = vld [vmem:[%s6115_s7 + $0x44] sm:$0xff]  ;;  %v6259_v58 = vld [vmem:[%s6115_s7 + $0x4c] sm:$0xff]  ;;  %v6263_v60 = vld [vmem:[%s6115_s7 + $0x54] sm:$0xff] }
  0x24   : > { %5245 = vmatmul.mubr.msk.f32.gmra.mrb[8].mxu1 %vm299_vm1, %v270_v24  ;;  %5469 = vmatmul.mubr.msk.f32.gmra.mrb[8].mxu0 %vm299_vm1, %v1882_v25  ;;  %v288_v61 = vld [vmem:[%s6115_s7 + $0xd9] sm:$0xff]  ;;  %v289_v63 = vld [vmem:[%s6115_s7 + $0xe1] sm:$0xff]  ;;  %v290_v2 = vld [vmem:[%s6115_s7 + $0xe9] sm:$0xff] }
  0x25   : > { %5247 = vmatprep.mubr.msk.f32.mxu1 %vm299_vm1, %v271_v26  ;;  %5471 = vmatprep.mubr.msk.f32.mxu0 %vm299_vm1, %v1883_v27  ;;  %v6273_v62 = vld [vmem:[%s6115_s7 + $0x5c] sm:$0xff]  ;;  %v6277_v0 = vld [vmem:[%s6115_s7 + $0x64] sm:$0xff]  ;;  %v6287_v3 = vld [vmem:[%s6115_s7 + $0x6c] sm:$0xff] }
  0x26   : > { %v291_v4 = vld [vmem:[%s6115_s7 + $0xf1] sm:$0xff]  ;;  %v292_v6 = vld [vmem:[%s6115_s7 + $0xf9] sm:$0xff]  ;;  %v293_v8 = vld [vmem:[%s6115_s7 + $0x101] sm:$0xff] }
  0x27   : > { %v6291_v5 = vld [vmem:[%s6115_s7 + $0x74] sm:$0xff]  ;;  %v6301_v7 = vld [vmem:[%s6115_s7 + $0x7c] sm:$0xff]  ;;  %v6305_v9 = vld [vmem:[%s6115_s7 + $0x84] sm:$0xff] }
  0x28   : > { %5248 = vmatmul.mubr.msk.f32.gmra.mrb[10].mxu1 %vm299_vm1, %v272_v28  ;;  %5472 = vmatmul.mubr.msk.f32.gmra.mrb[10].mxu0 %vm299_vm1, %v1884_v29  ;;  %v6315_v12 = vld [vmem:[%s6115_s7 + $0x8c] sm:$0xff]  ;;  %v6319_v14 = vld [vmem:[%s6115_s7 + $0x94] sm:$0xff]  ;;  %v6329_v16 = vld [vmem:[%s6115_s7 + $0x9c] sm:$0xff] }
  0x29   : > { %5250 = vmatprep.mubr.msk.f32.mxu1 %vm299_vm1, %v273_v30  ;;  %5474 = vmatprep.mubr.msk.f32.mxu0 %vm299_vm1, %v1885_v31  ;;  %v295_v13 = vld [vmem:[%s6115_s7 + $0x111] sm:$0xff]  ;;  %v296_v15 = vld [vmem:[%s6115_s7 + $0x119] sm:$0xff]  ;;  %v6333_v18 = vld [vmem:[%s6115_s7 + $0xa4] sm:$0xff] }
  0x2a   : > { %v224_v17 = vld [vmem:[%s6115_s7] sm:$0xff]  ;;  %v225_v19 = vld [vmem:[%s6115_s7 + $0x8] sm:$0xff]  ;;  %v226_v21 = vld [vmem:[%s6115_s7 + $0x10] sm:$0xff] }
  0x2b   : > { %v6343_v20 = vld [vmem:[%s6115_s7 + $0xac] sm:$0xff]  ;;  %v6347_v22 = vld [vmem:[%s6115_s7 + $0xb4] sm:$0xff]  ;;  %v6362_v25 = vld [vmem:[%s6115_s7 + $0xbc] sm:$0xff] }
  0x2c   : > { %5251 = vmatmul.mubr.msk.f32.gmra.mrb[12].mxu1 %vm299_vm1, %v274_v32  ;;  %5475 = vmatmul.mubr.msk.f32.gmra.mrb[12].mxu0 %vm299_vm1, %v1886_v33  ;;  %v6352_v23 = vld [vmem:[%s7344_s1 + $0xc] sm:$0xf]  ;;  %v227_v24 = vld [vmem:[%s6115_s7 + $0x18] sm:$0xff]  ;;  %v228_v26 = vld [vmem:[%s6115_s7 + $0x20] sm:$0xff] }
  0x2d   : > { %5253 = vmatprep.mubr.msk.f32.mxu1 %vm299_vm1, %v275_v34  ;;  %5477 = vmatprep.mubr.msk.f32.mxu0 %vm299_vm1, %v1887_v35  ;;  %v6368_v27 = vld [vmem:[%s6115_s7 + $0xc4] sm:$0xff]  ;;  %v6380_v28 = vld [vmem:[%s6115_s7 + $0xcc] sm:$0xff]  ;;  %v6384_v30 = vld [vmem:[%s6115_s7 + $0xd4] sm:$0xff] }
  0x2e   : > { %v230_v29 = vld [vmem:[%s6115_s7 + $0x30] sm:$0xff]  ;;  %v231_v31 = vld [vmem:[%s6115_s7 + $0x38] sm:$0xff]  ;;  %v232_v33 = vld [vmem:[%s6115_s7 + $0x40] sm:$0xff] }
  0x2f   : > { %v6394_v32 = vld [vmem:[%s6115_s7 + $0xdc] sm:$0xff]  ;;  %v6398_v34 = vld [vmem:[%s6115_s7 + $0xe4] sm:$0xff] }
  0x30   : > { %5254 = vmatmul.mubr.msk.f32.gmra.mrb[14].mxu1 %vm299_vm1, %v276_v36  ;;  %5478 = vmatmul.mubr.msk.f32.gmra.mrb[14].mxu0 %vm299_vm1, %v1888_v37  ;;  %v233_v35 = vld [vmem:[%s6115_s7 + $0x48] sm:$0xff]  ;;  %v234_v37 = vld [vmem:[%s6115_s7 + $0x50] sm:$0xff] }
  0x31   : > { %5256 = vmatprep.mubr.msk.f32.mxu1 %vm299_vm1, %v277_v38  ;;  %5480 = vmatprep.mubr.msk.f32.mxu0 %vm299_vm1, %v1889_v39  ;;  %v6408_v36 = vld [vmem:[%s6115_s7 + $0xec] sm:$0xff]  ;;  %v6412_v38 = vld [vmem:[%s6115_s7 + $0xf4] sm:$0xff] }
  0x32   : > { %v235_v39 = vld [vmem:[%s6115_s7 + $0x58] sm:$0xff] }
  0x34   : > { %5257 = vmatmul.mubr.msk.f32.gmra.mrb[16].mxu1 %vm299_vm1, %v278_v40  ;;  %5481 = vmatmul.mubr.msk.f32.gmra.mrb[16].mxu0 %vm299_vm1, %v1890_v41  ;;  %v6422_v40 = vld [vmem:[%s6115_s7 + $0xfc] sm:$0xff] }
  0x35   : > { %5259 = vmatprep.mubr.msk.f32.mxu1 %vm299_vm1, %v279_v42  ;;  %5512 = vmatprep.mubr.msk.f32.mxu0 %vm299_vm1, %v2303_v43  ;;  %v236_v41 = vld [vmem:[%s6115_s7 + $0x60] sm:$0xff]  ;;  %v237_v43 = vld [vmem:[%s6115_s7 + $0x68] sm:$0xff] }
  0x36   : > { %v6426_v42 = vld [vmem:[%s6115_s7 + $0x104] sm:$0xff] }
  0x38   : > { %5260 = vmatmul.mubr.msk.f32.gmra.mrb[18].mxu1 %vm299_vm1, %v280_v44  ;;  %5513 = vmatmul.mubr.msk.f32.vlgmr.msra.gmra.mrb[0].mxu0 %vm299_vm1, %v2304_v45  ;;  %v6436_v44 = vld [vmem:[%s6115_s7 + $0x10c] sm:$0xff] }
  0x39   : > { %5567 = vmatpush3.msk.msra.mxu0 %vm408_vm0, %v6130_v10  ;;  %5262 = vmatprep.mubr.msk.f32.mxu1 %vm299_vm1, %v281_v46  ;;  %v294_v10 = vld [vmem:[%s6115_s7 + $0x109] sm:$0xff]  ;;  %v6440_v46 = vld [vmem:[%s6115_s7 + $0x114] sm:$0xff] }
  0x3a   : > { %5515 = vmatprep.mubr.msk.f32.mxu0 %vm299_vm1, %v6213_v47  ;;  %5622 = vmatprep.subr.msk.mxu0 %vm408_vm0, %v6218_v48  ;;  %v238_v45 = vld [vmem:[%s6115_s7 + $0x70] sm:$0xff] }
  0x3c   : > { %5263 = vmatmul.mubr.msk.f32.gmra.mrb[20].mxu1 %vm299_vm1, %v282_v49  ;;  %5516 = vmatmul.mubr.msk.f32.gmra.mrb[2].mxu0 %vm299_vm1, %v6227_v50  ;;  %v239_v49 = vld [vmem:[%s6115_s7 + $0x78] sm:$0xff] }
  0x3d   : > { %5265 = vmatprep.mubr.msk.f32.mxu1 %vm299_vm1, %v283_v51  ;;  %5518 = vmatprep.mubr.msk.f32.mxu0 %vm299_vm1, %v6233_v52  ;;  %v6450_v51 = vld [vmem:[%s6115_s7 + $0x11c] sm:$0xff] }
  0x40   : > { %5266 = vmatmul.mubr.msk.f32.gmra.mrb[22].mxu1 %vm299_vm1, %v284_v53  ;;  %5519 = vmatmul.mubr.msk.f32.gmra.mrb[4].mxu0 %vm299_vm1, %v6245_v54  ;;  %v240_v53 = vld [vmem:[%s6115_s7 + $0x80] sm:$0xff] }
  0x41   : > { %5268 = vmatprep.mubr.msk.f32.mxu1 %vm299_vm1, %v285_v55  ;;  %5521 = vmatprep.mubr.msk.f32.mxu0 %vm299_vm1, %v6249_v56  ;;  %v6454_v55 = vld [vmem:[%s6115_s7 + $0x124] sm:$0xff] }
  0x44   : > { %5269 = vmatmul.mubr.msk.f32.gmra.mrb[24].mxu1 %vm299_vm1, %v286_v57  ;;  %5522 = vmatmul.mubr.msk.f32.gmra.mrb[6].mxu0 %vm299_vm1, %v6259_v58  ;;  %v241_v57 = vld [vmem:[%s6115_s7 + $0x88] sm:$0xff] }
  0x45   : > { %5271 = vmatprep.mubr.msk.f32.mxu1 %vm299_vm1, %v287_v59  ;;  %5524 = vmatprep.mubr.msk.f32.mxu0 %vm299_vm1, %v6263_v60  ;;  %v6464_v59 = vld [vmem:[%s6115_s7 + $0x12c] sm:$0xff] }
  0x48   : > { %5272 = vmatmul.mubr.msk.f32.gmra.mrb[26].mxu1 %vm299_vm1, %v288_v61  ;;  %5525 = vmatmul.mubr.msk.f32.gmra.mrb[8].mxu0 %vm299_vm1, %v6273_v62  ;;  %v242_v61 = vld [vmem:[%s6115_s7 + $0x90] sm:$0xff] }
  0x49   : > { %5274 = vmatprep.mubr.msk.f32.mxu1 %vm299_vm1, %v289_v63  ;;  %5527 = vmatprep.mubr.msk.f32.mxu0 %vm299_vm1, %v6277_v0  ;;  %v243_v63 = vld [vmem:[%s6115_s7 + $0x98] sm:$0xff] }
  0x4c   : > { %5275 = vmatmul.mubr.msk.f32.gmra.mrb[28].mxu1 %vm299_vm1, %v290_v2  ;;  %5528 = vmatmul.mubr.msk.f32.gmra.mrb[10].mxu0 %vm299_vm1, %v6287_v3  ;;  %v244_v2 = vld [vmem:[%s6115_s7 + $0xa0] sm:$0xff] }
  0x4d   : > { %5277 = vmatprep.mubr.msk.f32.mxu1 %vm299_vm1, %v291_v4  ;;  %5530 = vmatprep.mubr.msk.f32.mxu0 %vm299_vm1, %v6291_v5  ;;  %v6478_v4 = vld [vmem:[%s7344_s1 + $0x20] sm:$0xf] }
  0x50   : > { %5278 = vmatmul.mubr.msk.f32.gmra.mrb[30].mxu1 %vm299_vm1, %v292_v6  ;;  %5531 = vmatmul.mubr.msk.f32.gmra.mrb[12].mxu0 %vm299_vm1, %v6301_v7  ;;  %v246_v6 = vld [vmem:[%s6115_s7 + $0xb0] sm:$0xff] }
  0x51   : > { %5280 = vmatprep.mubr.msk.f32.mxu1 %vm299_vm1, %v293_v8  ;;  %5533 = vmatprep.mubr.msk.f32.mxu0 %vm299_vm1, %v6305_v9  ;;  %v259_v8 = vld [vmem:[%s6115_s7 + $0x118] sm:$0xff] }
  0x54   : > { %5281 = vmatmul.mubr.msk.f32.gmra.mrb[32].mxu1 %vm299_vm1, %v294_v10  ;;  %5534 = vmatmul.mubr.msk.f32.gmra.mrb[14].mxu0 %vm299_vm1, %v6315_v12  ;;  %v4102_v10 = vld [vmem:[%s7346_s3] sm:$0xff] }
  0x55   : > { %5283 = vmatprep.mubr.msk.f32.mxu1 %vm299_vm1, %v295_v13  ;;  %5536 = vmatprep.mubr.msk.f32.mxu0 %vm299_vm1, %v6319_v14  ;;  %v6559_v13 = vld [vmem:[%s6115_s7 + $0x12] sm:$0xff] }
  0x58   : > { %5284 = vmatmul.mubr.msk.f32.gmra.mrb[34].mxu1 %vm299_vm1, %v296_v15  ;;  %5537 = vmatmul.mubr.msk.f32.gmra.mrb[16].mxu0 %vm299_vm1, %v6329_v16  ;;  %v4104_v15 = vld [vmem:[%s7346_s3 + $0x10] sm:$0xff] }
  0x59   : > { %5288 = vmatprep.mubr.msk.f32.mxu1 %vm299_vm1, %v224_v17  ;;  %5539 = vmatprep.mubr.msk.f32.mxu0 %vm299_vm1, %v6333_v18  ;;  %v6575_v17 = vld [vmem:[%s6115_s7 + $0x1a] sm:$0xff] }
  0x5c   : > { %5289 = vmatmul.mubr.msk.f32.vlgmr.msra.gmra.mrb[0].mxu1 %vm299_vm1, %v225_v19  ;;  %5540 = vmatmul.mubr.msk.f32.gmra.mrb[18].mxu0 %vm299_vm1, %v6343_v20  ;;  %v4105_v19 = vld [vmem:[%s7346_s3 + $0x18] sm:$0xff] }
  0x5d   : > { %5343 = vmatpush3.msk.msra.mxu1 %vm408_vm0, %v6135_v11  ;;  %5291 = vmatprep.mubr.msk.f32.mxu1 %vm299_vm1, %v226_v21  ;;  %v229_v11 = vld [vmem:[%s6115_s7 + $0x28] sm:$0xff]  ;;  %v6602_v21 = vld [vmem:[%s6115_s7 + $0x32] sm:$0xff] }
  0x5e   : > { %5542 = vmatprep.mubr.msk.f32.mxu0 %vm299_vm1, %v6347_v22  ;;  %5398 = vmatprep.subr.msk.mxu1 %vm408_vm0, %v6352_v23 }
  0x60   : > { %5292 = vmatmul.mubr.msk.f32.gmra.mrb[2].mxu1 %vm299_vm1, %v227_v24  ;;  %5543 = vmatmul.mubr.msk.f32.gmra.mrb[20].mxu0 %vm299_vm1, %v6362_v25  ;;  %v6619_v24 = vld [vmem:[%s6115_s7 + $0x3a] sm:$0xff] }
  0x61   : > { %5294 = vmatprep.mubr.msk.f32.mxu1 %vm299_vm1, %v228_v26  ;;  %5545 = vmatprep.mubr.msk.f32.mxu0 %vm299_vm1, %v6368_v27  ;;  %v4109_v26 = vld [vmem:[%s7346_s3 + $0x38] sm:$0xff] }
  0x64   : > { %5295 = vmatmul.mubr.msk.f32.gmra.mrb[4].mxu1 %vm299_vm1, %v229_v11  ;;  %5546 = vmatmul.mubr.msk.f32.gmra.mrb[22].mxu0 %vm299_vm1, %v6380_v28  ;;  %v6639_v11 = vld [vmem:[%s6115_s7 + $0x4a] sm:$0xff] }
  0x65   : > { %5297 = vmatprep.mubr.msk.f32.mxu1 %vm299_vm1, %v230_v29  ;;  %5548 = vmatprep.mubr.msk.f32.mxu0 %vm299_vm1, %v6384_v30  ;;  %v4111_v29 = vld [vmem:[%s7346_s3 + $0x48] sm:$0xff] }
  0x68   : > { %5298 = vmatmul.mubr.msk.f32.gmra.mrb[6].mxu1 %vm299_vm1, %v231_v31  ;;  %5549 = vmatmul.mubr.msk.f32.gmra.mrb[24].mxu0 %vm299_vm1, %v6394_v32  ;;  %v6659_v31 = vld [vmem:[%s6115_s7 + $0x5a] sm:$0xff] }
  0x69   : > { %5300 = vmatprep.mubr.msk.f32.mxu1 %vm299_vm1, %v232_v33  ;;  %5551 = vmatprep.mubr.msk.f32.mxu0 %vm299_vm1, %v6398_v34  ;;  %v4113_v33 = vld [vmem:[%s7346_s3 + $0x58] sm:$0xff] }
  0x6c   : > { %5301 = vmatmul.mubr.msk.f32.gmra.mrb[8].mxu1 %vm299_vm1, %v233_v35  ;;  %5552 = vmatmul.mubr.msk.f32.gmra.mrb[26].mxu0 %vm299_vm1, %v6408_v36  ;;  %v6679_v35 = vld [vmem:[%s6115_s7 + $0x6a] sm:$0xff] }
  0x6d   : > { %5303 = vmatprep.mubr.msk.f32.mxu1 %vm299_vm1, %v234_v37  ;;  %5554 = vmatprep.mubr.msk.f32.mxu0 %vm299_vm1, %v6412_v38  ;;  %v4115_v37 = vld [vmem:[%s7346_s3 + $0x68] sm:$0xff] }
  0x70   : > { %5304 = vmatmul.mubr.msk.f32.gmra.mrb[10].mxu1 %vm299_vm1, %v235_v39  ;;  %5555 = vmatmul.mubr.msk.f32.gmra.mrb[28].mxu0 %vm299_vm1, %v6422_v40  ;;  %v6699_v39 = vld [vmem:[%s6115_s7 + $0x7a] sm:$0xff] }
  0x71   : > { %5306 = vmatprep.mubr.msk.f32.mxu1 %vm299_vm1, %v236_v41  ;;  %5557 = vmatprep.mubr.msk.f32.mxu0 %vm299_vm1, %v6426_v42  ;;  %v2767_v41 = vld [vmem:[%s6115_s7 + $0x134] sm:$0xff] }
  0x74   : > { %5307 = vmatmul.mubr.msk.f32.gmra.mrb[12].mxu1 %vm299_vm1, %v237_v43  ;;  %5558 = vmatmul.mubr.msk.f32.gmra.mrb[30].mxu0 %vm299_vm1, %v6436_v44  ;;  %v4118_v43 = vld [vmem:[%s7346_s3 + $0x80] sm:$0xff] }
  0x75   : > { %5309 = vmatprep.mubr.msk.f32.mxu1 %vm299_vm1, %v238_v45  ;;  %5560 = vmatprep.mubr.msk.f32.mxu0 %vm299_vm1, %v6440_v46  ;;  %v2768_v45 = vld [vmem:[%s6115_s7 + $0x13c] sm:$0xff] }
  0x78   : > { %5310 = vmatmul.mubr.msk.f32.gmra.mrb[14].mxu1 %vm299_vm1, %v239_v49  ;;  %5561 = vmatmul.mubr.msk.f32.gmra.mrb[32].mxu0 %vm299_vm1, %v6450_v51  ;;  %v3163_v49 = vld [vmem:[%s6115_s7 + $0x25] sm:$0xff] }
  0x79   : > { %5312 = vmatprep.mubr.msk.f32.mxu1 %vm299_vm1, %v240_v53  ;;  %5563 = vmatprep.mubr.msk.f32.mxu0 %vm299_vm1, %v6454_v55  ;;  %v4120_v53 = vld [vmem:[%s7346_s3 + $0x90] sm:$0xff] }
  0x7c   : > { %5313 = vmatmul.mubr.msk.f32.gmra.mrb[16].mxu1 %vm299_vm1, %v241_v57  ;;  %5564 = vmatmul.mubr.msk.f32.gmra.mrb[34].mxu0 %vm299_vm1, %v6464_v59  ;;  %v3164_v57 = vld [vmem:[%s6115_s7 + $0x2d] sm:$0xff] }
  0x7d   : > { %5315 = vmatprep.mubr.msk.f32.mxu1 %vm299_vm1, %v242_v61  ;;  %5568 = vmatprep.mubr.msk.f32.mxu0 %vm299_vm1, %v6213_v47  ;;  %v245_v47 = vld [vmem:[%s6115_s7 + $0xa8] sm:$0xff]  ;;  %v3165_v61 = vld [vmem:[%s6115_s7 + $0x35] sm:$0xff] }
  0x80   : > { %5316 = vmatmul.mubr.msk.f32.gmra.mrb[18].mxu1 %vm299_vm1, %v243_v63  ;;  %5569 = vmatmul.mubr.msk.f32.vlgmr.msra.gmra.mrb[0].mxu0 %vm299_vm1, %v6227_v50  ;;  %v248_v50 = vld [vmem:[%s6115_s7 + $0xc0] sm:$0xff]  ;;  %v4121_v63 = vld [vmem:[%s7346_s3 + $0x98] sm:$0xff] }
  0x81   : > { %5623 = vmatpush3.msk.msra.mxu0 %vm408_vm0, %v6218_v48  ;;  %5318 = vmatprep.mubr.msk.f32.mxu1 %vm299_vm1, %v244_v2  ;;  %v247_v48 = vld [vmem:[%s6115_s7 + $0xb8] sm:$0xff]  ;;  %v4122_v2 = vld [vmem:[%s7346_s3 + $0xa0] sm:$0xff] }
  0x82   : > { %5571 = vmatprep.mubr.msk.f32.mxu0 %vm299_vm1, %v6233_v52  ;;  %5678 = vmatprep.subr.msk.mxu0 %vm408_vm0, %v6478_v4  ;;  %v249_v52 = vld [vmem:[%s6115_s7 + $0xc8] sm:$0xff] }
  0x84   : > { %5319 = vmatmul.mubr.msk.f32.gmra.mrb[20].mxu1 %vm299_vm1, %v245_v47  ;;  %5572 = vmatmul.mubr.msk.f32.gmra.mrb[2].mxu0 %vm299_vm1, %v6245_v54  ;;  %v250_v54 = vld [vmem:[%s6115_s7 + $0xd0] sm:$0xff] }
  0x85   : > { %5321 = vmatprep.mubr.msk.f32.mxu1 %vm299_vm1, %v246_v6  ;;  %5574 = vmatprep.mubr.msk.f32.mxu0 %vm299_vm1, %v6249_v56  ;;  %v251_v56 = vld [vmem:[%s6115_s7 + $0xd8] sm:$0xff]  ;;  %v6760_v47 = vld [vmem:[%s6115_s7 + $0xaa] sm:$0xff] }
  0x86   : > { %v3166_v6 = vld [vmem:[%s6115_s7 + $0x3d] sm:$0xff] }
  0x88   : > { %5322 = vmatmul.mubr.msk.f32.gmra.mrb[22].mxu1 %vm299_vm1, %v247_v48  ;;  %5575 = vmatmul.mubr.msk.f32.gmra.mrb[4].mxu0 %vm299_vm1, %v6259_v58  ;;  %v252_v58 = vld [vmem:[%s6115_s7 + $0xe0] sm:$0xff]  ;;  %v6765_v48 = vld [vmem:[%s6115_s7 + $0xb2] sm:$0xff] }
  0x89   : > { %5324 = vmatprep.mubr.msk.f32.mxu1 %vm299_vm1, %v248_v50  ;;  %5577 = vmatprep.mubr.msk.f32.mxu0 %vm299_vm1, %v6263_v60  ;;  %v253_v60 = vld [vmem:[%s6115_s7 + $0xe8] sm:$0xff] }
  0x8a   : > { %v3167_v50 = vld [vmem:[%s6115_s7 + $0x45] sm:$0xff] }
  0x8c   : > { %5325 = vmatmul.mubr.msk.f32.gmra.mrb[24].mxu1 %vm299_vm1, %v249_v52  ;;  %5578 = vmatmul.mubr.msk.f32.gmra.mrb[6].mxu0 %vm299_vm1, %v6273_v62  ;;  %v254_v62 = vld [vmem:[%s6115_s7 + $0xf0] sm:$0xff] }
  0x8d   : > { %5327 = vmatprep.mubr.msk.f32.mxu1 %vm299_vm1, %v250_v54  ;;  %5580 = vmatprep.mubr.msk.f32.mxu0 %vm299_vm1, %v6277_v0  ;;  %v255_v0 = vld [vmem:[%s6115_s7 + $0xf8] sm:$0xff]  ;;  %v4124_v52 = vld [vmem:[%s7346_s3 + $0xb0] sm:$0xff] }
  0x8e   : > { %v6781_v54 = vld [vmem:[%s6115_s7 + $0xba] sm:$0xff] }
  0x90   : > { %5328 = vmatmul.mubr.msk.f32.gmra.mrb[26].mxu1 %vm299_vm1, %v251_v56  ;;  %5581 = vmatmul.mubr.msk.f32.gmra.mrb[8].mxu0 %vm299_vm1, %v6287_v3  ;;  %v256_v3 = vld [vmem:[%s6115_s7 + $0x100] sm:$0xff]  ;;  %v3168_v56 = vld [vmem:[%s6115_s7 + $0x4d] sm:$0xff] }
  0x91   : > { %5330 = vmatprep.mubr.msk.f32.mxu1 %vm299_vm1, %v252_v58  ;;  %5583 = vmatprep.mubr.msk.f32.mxu0 %vm299_vm1, %v6291_v5  ;;  %v257_v5 = vld [vmem:[%s6115_s7 + $0x108] sm:$0xff] }
  0x92   : > { %v6785_v58 = vld [vmem:[%s6115_s7 + $0xc2] sm:$0xff] }
  0x94   : > { %5331 = vmatmul.mubr.msk.f32.gmra.mrb[28].mxu1 %vm299_vm1, %v253_v60  ;;  %5584 = vmatmul.mubr.msk.f32.gmra.mrb[10].mxu0 %vm299_vm1, %v6301_v7  ;;  %v258_v7 = vld [vmem:[%s6115_s7 + $0x110] sm:$0xff] }
  0x95   : > { %5333 = vmatprep.mubr.msk.f32.mxu1 %vm299_vm1, %v254_v62  ;;  %5586 = vmatprep.mubr.msk.f32.mxu0 %vm299_vm1, %v6305_v9  ;;  %v1013_v9 = vld [vmem:[%s6115_s7 + $0x2] sm:$0xff]  ;;  %v3169_v60 = vld [vmem:[%s6115_s7 + $0x55] sm:$0xff] }
  0x96   : > { %v4125_v62 = vld [vmem:[%s7346_s3 + $0xb8] sm:$0xff] }
  0x98   : > { %5334 = vmatmul.mubr.msk.f32.gmra.mrb[30].mxu1 %vm299_vm1, %v255_v0  ;;  %5587 = vmatmul.mubr.msk.f32.gmra.mrb[12].mxu0 %vm299_vm1, %v6315_v12  ;;  %v1014_v12 = vld [vmem:[%s6115_s7 + $0xa] sm:$0xff]  ;;  %v4126_v0 = vld [vmem:[%s7346_s3 + $0xc0] sm:$0xff] }
  0x99   : > { %5336 = vmatprep.mubr.msk.f32.mxu1 %vm299_vm1, %v256_v3  ;;  %5589 = vmatprep.mubr.msk.f32.mxu0 %vm299_vm1, %v6319_v14  ;;  %v6046_v14 = vmov 0   ;;  %v6801_v3 = vld [vmem:[%s6115_s7 + $0xca] sm:$0xff] }
  0x9a   : > { %6035 = vset.pattern.permute.xlu0 %v6046_v14  ;;  %6036 = vset.pattern.permute.xlu1 %v6046_v14  ;;  %v3172_v14 = vld [vmem:[%s6115_s7 + $0x6d] sm:$0xff] }
  0x9b   : > { %4140 = vperm.xlu0 %6035, %v4102_v10   ;;  %4150 = vperm.xlu1 %6036, %v4104_v15   ;;  %v4128_v10 = vld [vmem:[%s7346_s3 + $0xd0] sm:$0xff]  ;;  %v6825_v15 = vld [vmem:[%s6115_s7 + $0xe2] sm:$0xff] }
  0x9c   : > { %5337 = vmatmul.mubr.msk.f32.gmra.mrb[32].mxu1 %vm299_vm1, %v257_v5  ;;  %5590 = vmatmul.mubr.msk.f32.gmra.mrb[14].mxu0 %vm299_vm1, %v6329_v16  ;;  %v4103_v16 = vld [vmem:[%s7346_s3 + $0x8] sm:$0xff]  ;;  %v3170_v5 = vld [vmem:[%s6115_s7 + $0x5d] sm:$0xff] }
  0x9d   : > { %5339 = vmatprep.mubr.msk.f32.mxu1 %vm299_vm1, %v258_v7  ;;  %5592 = vmatprep.mubr.msk.f32.mxu0 %vm299_vm1, %v6333_v18  ;;  %v6580_v18 = vld [vmem:[%s6115_s7 + $0x22] sm:$0xff]  ;;  %v6805_v7 = vld [vmem:[%s6115_s7 + $0xd2] sm:$0xff] }
  0x9f   : > { %4145 = vperm.xlu0 %6035, %v4103_v16   ;;  %4155 = vperm.xlu1 %6036, %v4105_v19   ;;  %v3173_v16 = vld [vmem:[%s6115_s7 + $0x75] sm:$0xff] }
  0xa0   : > { %5340 = vmatmul.mubr.msk.f32.gmra.mrb[34].mxu1 %vm299_vm1, %v259_v8  ;;  %5593 = vmatmul.mubr.msk.f32.gmra.mrb[16].mxu0 %vm299_vm1, %v6343_v20  ;;  %v4106_v20 = vld [vmem:[%s7346_s3 + $0x20] sm:$0xff]  ;;  %v4129_v19 = vld [vmem:[%s7346_s3 + $0xd8] sm:$0xff] }
  0xa1   : > { %5344 = vmatprep.mubr.msk.f32.mxu1 %vm299_vm1, %v1013_v9  ;;  %5595 = vmatprep.mubr.msk.f32.mxu0 %vm299_vm1, %v6347_v22  ;;  %v4107_v22 = vld [vmem:[%s7346_s3 + $0x28] sm:$0xff] }
  0xa2   : > { %v3171_v8 = vld [vmem:[%s6115_s7 + $0x65] sm:$0xff] }
  0xa3   : > { %4160 = vperm.xlu0 %6035, %v4106_v20   ;;  %4165 = vperm.xlu1 %6036, %v4107_v22   ;;  %v4127_v9 = vld [vmem:[%s7346_s3 + $0xc8] sm:$0xff]  ;;  %v4130_v20 = vld [vmem:[%s7346_s3 + $0xe0] sm:$0xff] }
  0xa4   : > { %5345 = vmatmul.mubr.msk.f32.vlgmr.msra.gmra.mrb[0].mxu1 %vm299_vm1, %v1014_v12  ;;  %5596 = vmatmul.mubr.msk.f32.gmra.mrb[18].mxu0 %vm299_vm1, %v6362_v25  ;;  %v6622_v25 = vld [vmem:[%s6115_s7 + $0x42] sm:$0xff]  ;;  %v6821_v12 = vld [vmem:[%s6115_s7 + $0xda] sm:$0xff]  ;;  %v6841_v22 = vld [vmem:[%s6115_s7 + $0xea] sm:$0xff] }
  0xa5   : > { %5399 = vmatpush3.msk.msra.mxu1 %vm408_vm0, %v6352_v23  ;;  %5347 = vmatprep.mubr.msk.f32.mxu1 %vm299_vm1, %v6559_v13  ;;  %v4108_v23 = vld [vmem:[%s7346_s3 + $0x30] sm:$0xff] }
  0xa6   : > { %5598 = vmatprep.mubr.msk.f32.mxu0 %vm299_vm1, %v6368_v27  ;;  %5734 = vmatprep.subr.msk.mxu1 %vm408_vm0, %v6094_v1  ;;  %v6599_v1 = vld [vmem:[%s6115_s7 + $0x2a] sm:$0xff]  ;;  %v4110_v27 = vld [vmem:[%s7346_s3 + $0x40] sm:$0xff] }
  0xa7   : > { %4170 = vperm.xlu0 %6035, %v4108_v23   ;;  %4175 = vperm.xlu1 %6036, %v4109_v26   ;;  %v3174_v23 = vld [vmem:[%s6115_s7 + $0x7d] sm:$0xff]  ;;  %v6845_v26 = vld [vmem:[%s6115_s7 + $0xf2] sm:$0xff] }
  0xa8   : > { %5348 = vmatmul.mubr.msk.f32.gmra.mrb[2].mxu1 %vm299_vm1, %v6575_v17  ;;  %5599 = vmatmul.mubr.msk.f32.gmra.mrb[20].mxu0 %vm299_vm1, %v6380_v28  ;;  %v6642_v28 = vld [vmem:[%s6115_s7 + $0x52] sm:$0xff] }
  0xa9   : > { %5350 = vmatprep.mubr.msk.f32.mxu1 %vm299_vm1, %v6580_v18  ;;  %5601 = vmatprep.mubr.msk.f32.mxu0 %vm299_vm1, %v6384_v30  ;;  %v4112_v30 = vld [vmem:[%s7346_s3 + $0x50] sm:$0xff] }
  0xab   : > { %4180 = vperm.xlu0 %6035, %v4110_v27   ;;  %4185 = vperm.xlu1 %6036, %v4111_v29   ;;  %v3175_v27 = vld [vmem:[%s6115_s7 + $0x85] sm:$0xff] }
  0xac   : > { %5351 = vmatmul.mubr.msk.f32.gmra.mrb[4].mxu1 %vm299_vm1, %v6599_v1  ;;  %5602 = vmatmul.mubr.msk.f32.gmra.mrb[22].mxu0 %vm299_vm1, %v6394_v32  ;;  %v6662_v32 = vld [vmem:[%s6115_s7 + $0x62] sm:$0xff] }
  0xad   : > { %5353 = vmatprep.mubr.msk.f32.mxu1 %vm299_vm1, %v6602_v21  ;;  %5604 = vmatprep.mubr.msk.f32.mxu0 %vm299_vm1, %v6398_v34  ;;  %v4114_v34 = vld [vmem:[%s7346_s3 + $0x60] sm:$0xff]  ;;  %v4131_v29 = vld [vmem:[%s7346_s3 + $0xe8] sm:$0xff] }
  0xaf   : > { %4190 = vperm.xlu0 %6035, %v4112_v30   ;;  %4195 = vperm.xlu1 %6036, %v4113_v33   ;;  %v4132_v30 = vld [vmem:[%s7346_s3 + $0xf0] sm:$0xff]  ;;  %v6861_v33 = vld [vmem:[%s6115_s7 + $0xfa] sm:$0xff] }
  0xb0   : > { %5354 = vmatmul.mubr.msk.f32.gmra.mrb[6].mxu1 %vm299_vm1, %v6619_v24  ;;  %5605 = vmatmul.mubr.msk.f32.gmra.mrb[24].mxu0 %vm299_vm1, %v6408_v36  ;;  %v6682_v36 = vld [vmem:[%s6115_s7 + $0x72] sm:$0xff] }
  0xb1   : > { %5356 = vmatprep.mubr.msk.f32.mxu1 %vm299_vm1, %v6622_v25  ;;  %5607 = vmatprep.mubr.msk.f32.mxu0 %vm299_vm1, %v6412_v38  ;;  %v4116_v38 = vld [vmem:[%s7346_s3 + $0x70] sm:$0xff] }
  0xb3   : > { %4200 = vperm.xlu0 %6035, %v4114_v34   ;;  %4205 = vperm.xlu1 %6036, %v4115_v37   ;;  %v3176_v34 = vld [vmem:[%s6115_s7 + $0x8d] sm:$0xff]  ;;  %v6865_v37 = vld [vmem:[%s6115_s7 + $0x102] sm:$0xff] }
  0xb4   : > { %5357 = vmatmul.mubr.msk.f32.gmra.mrb[8].mxu1 %vm299_vm1, %v6639_v11  ;;  %5608 = vmatmul.mubr.msk.f32.gmra.mrb[26].mxu0 %vm299_vm1, %v6422_v40  ;;  %v6702_v40 = vld [vmem:[%s6115_s7 + $0x82] sm:$0xff] }
  0xb5   : > { %5359 = vmatprep.mubr.msk.f32.mxu1 %vm299_vm1, %v6642_v28  ;;  %5610 = vmatprep.mubr.msk.f32.mxu0 %vm299_vm1, %v6426_v42  ;;  %v4117_v42 = vld [vmem:[%s7346_s3 + $0x78] sm:$0xff] }
  0xb7   : > { %4210 = vperm.xlu0 %6035, %v4116_v38   ;;  %4215 = vperm.xlu1 %6036, %v4117_v42   ;;  %v3177_v38 = vld [vmem:[%s6115_s7 + $0x95] sm:$0xff]  ;;  %v4134_v42 = vld [vmem:[%s7346_s3 + $0x100] sm:$0xff] }
  0xb8   : > { %5360 = vmatmul.mubr.msk.f32.gmra.mrb[10].mxu1 %vm299_vm1, %v6659_v31  ;;  %5611 = vmatmul.mubr.msk.f32.gmra.mrb[28].mxu0 %vm299_vm1, %v6436_v44  ;;  %v6719_v44 = vld [vmem:[%s6115_s7 + $0x8a] sm:$0xff] }
  0xb9   : > { %5362 = vmatprep.mubr.msk.f32.mxu1 %vm299_vm1, %v6662_v32  ;;  %5613 = vmatprep.mubr.msk.f32.mxu0 %vm299_vm1, %v6440_v46  ;;  %v6723_v46 = vld [vmem:[%s6115_s7 + $0x92] sm:$0xff] }
  0xbb   : > { %4220 = vperm.xlu0 %6035, %v4118_v43   ;;  %v6881_v43 = vld [vmem:[%s6115_s7 + $0x10a] sm:$0xff] }
  0xbc   : > { %5363 = vmatmul.mubr.msk.f32.gmra.mrb[12].mxu1 %vm299_vm1, %v6679_v35  ;;  %5614 = vmatmul.mubr.msk.f32.gmra.mrb[30].mxu0 %vm299_vm1, %v6450_v51  ;;  %v4119_v51 = vld [vmem:[%s7346_s3 + $0x88] sm:$0xff] }
  0xbd   : > { %5365 = vmatprep.mubr.msk.f32.mxu1 %vm299_vm1, %v6682_v36  ;;  %5616 = vmatprep.mubr.msk.f32.mxu0 %vm299_vm1, %v6454_v55  ;;  %v6739_v55 = vld [vmem:[%s6115_s7 + $0x9a] sm:$0xff] }
  0xbe   : > { %4225 = vperm.xlu1 %6036, %v4119_v51   ;;  %v3179_v51 = vld [vmem:[%s6115_s7 + $0xa5] sm:$0xff] }
  0xbf   : > { %4230 = vperm.xlu0 %6035, %v4120_v53   ;;  %v4135_v53 = vld [vmem:[%s7346_s3 + $0x108] sm:$0xff] }
  0xc0   : > { %5366 = vmatmul.mubr.msk.f32.gmra.mrb[14].mxu1 %vm299_vm1, %v6699_v39  ;;  %5617 = vmatmul.mubr.msk.f32.gmra.mrb[32].mxu0 %vm299_vm1, %v6464_v59  ;;  %v6743_v59 = vld [vmem:[%s6115_s7 + $0xa2] sm:$0xff] }
  0xc1   : > { %5368 = vmatprep.mubr.msk.f32.mxu1 %vm299_vm1, %v6702_v40  ;;  %5619 = vmatprep.mubr.msk.f32.mxu0 %vm299_vm1, %v2767_v41  ;;  %v4133_v41 = vld [vmem:[%s7346_s3 + $0xf8] sm:$0xff] }
  0xc2   : > { %4235 = vperm.xlu1 %6036, %v4121_v63   ;;  %v3180_v63 = vld [vmem:[%s6115_s7 + $0xad] sm:$0xff] }
  0xc3   : > { %4240 = vperm.xlu0 %6035, %v4122_v2   ;;  %v3181_v2 = vld [vmem:[%s6115_s7 + $0xb5] sm:$0xff] }
  0xc4   : > { %5369 = vmatmul.mubr.msk.f32.gmra.mrb[16].mxu1 %vm299_vm1, %v6719_v44  ;;  %5620 = vmatmul.mubr.msk.f32.gmra.mrb[34].mxu0 %vm299_vm1, %v2768_v45  ;;  %v3178_v45 = vld [vmem:[%s6115_s7 + $0x9d] sm:$0xff] }
  0xc5   : > { %5371 = vmatprep.mubr.msk.f32.mxu1 %vm299_vm1, %v6723_v46  ;;  %5624 = vmatprep.mubr.msk.f32.mxu0 %vm299_vm1, %v3163_v49  ;;  %v6885_v49 = vld [vmem:[%s6115_s7 + $0x112] sm:$0xff] }
  0xc7   : > { %4250 = vperm.xlu0 %6035, %v4124_v52   ;;  %v6037_v52 = vld [vmem:[%s7344_s1 + $0x10] sm:$0xf] }
  0xc8   : > { %5372 = vmatmul.mubr.msk.f32.gmra.mrb[18].mxu1 %vm299_vm1, %v6739_v55  ;;  %5625 = vmatmul.mubr.msk.f32.vlgmr.msra.gmra.mrb[0].mxu0 %vm299_vm1, %v3164_v57  ;;  %v4136_v57 = vld [vmem:[%s7346_s3 + $0x110] sm:$0xff] }
  0xc9   : > { %5679 = vmatpush3.msk.msra.mxu0 %vm408_vm0, %v6478_v4  ;;  %5374 = vmatprep.mubr.msk.f32.mxu1 %vm299_vm1, %v6743_v59  ;;  %v4123_v4 = vld [vmem:[%s7346_s3 + $0xa8] sm:$0xff] }
  0xca   : > { %5627 = vmatprep.mubr.msk.f32.mxu0 %vm299_vm1, %v3165_v61  ;;  %4245 = vperm.xlu1 %6036, %v4123_v4   ;;  %v6901_v61 = vld [vmem:[%s6115_s7 + $0x11a] sm:$0xff]  ;;  %v3183_v4 = vld [vmem:[%s6115_s7 + $0xc5] sm:$0xff] }
  0xcb   : > { %4260 = vperm.xlu0 %6035, %v4126_v0   ;;  %v3604_v0 = vld [vmem:[%s6115_s7 + $0x7e] sm:$0xff] }
  0xcc   : > { %5375 = vmatmul.mubr.msk.f32.gmra.mrb[20].mxu1 %vm299_vm1, %v6760_v47  ;;  %5628 = vmatmul.mubr.msk.f32.gmra.mrb[2].mxu0 %vm299_vm1, %v3166_v6  ;;  %v4137_v6 = vld [vmem:[%s7346_s3 + $0x118] sm:$0xff] }
  0xcd   : > { %5377 = vmatprep.mubr.msk.f32.mxu1 %vm299_vm1, %v6765_v48  ;;  %5630 = vmatprep.mubr.msk.f32.mxu0 %vm299_vm1, %v3167_v50  ;;  %v3182_v50 = vld [vmem:[%s6115_s7 + $0xbd] sm:$0xff] }
  0xce   : > { %4255 = vperm.xlu1 %6036, %v4125_v62   ;;  %v3603_v62 = vld [vmem:[%s6115_s7 + $0x76] sm:$0xff] }
  0xcf   : > { %4270 = vperm.xlu0 %6035, %v4128_v10   ;;  %v3609_v10 = vld [vmem:[%s6115_s7 + $0xa6] sm:$0xff] }
  0xd0   : > { %5378 = vmatmul.mubr.msk.f32.gmra.mrb[22].mxu1 %vm299_vm1, %v6781_v54  ;;  %5631 = vmatmul.mubr.msk.f32.gmra.mrb[4].mxu0 %vm299_vm1, %v3168_v56  ;;  %v3185_v56 = vld [vmem:[%s6115_s7 + $0xd5] sm:$0xff] }
  0xd1   : > { %5380 = vmatprep.mubr.msk.f32.mxu1 %vm299_vm1, %v6785_v58  ;;  %5633 = vmatprep.mubr.msk.f32.mxu0 %vm299_vm1, %v3169_v60  ;;  %v3187_v60 = vld [vmem:[%s6115_s7 + $0xe5] sm:$0xff] }
  0xd2   : > { %4265 = vperm.xlu1 %6036, %v4127_v9   ;;  %v1477_v9 = vld [vmem:[%s6115_s7 + $0x122] sm:$0xff] }
  0xd3   : > { %4280 = vperm.xlu0 %6035, %v4130_v20   ;;  %v3612_v20 = vld [vmem:[%s6115_s7 + $0xbe] sm:$0xff] }
  0xd4   : > { %5381 = vmatmul.mubr.msk.f32.gmra.mrb[24].mxu1 %vm299_vm1, %v6801_v3  ;;  %5634 = vmatmul.mubr.msk.f32.gmra.mrb[6].mxu0 %vm299_vm1, %v3170_v5  ;;  %v3606_v5 = vld [vmem:[%s6115_s7 + $0x8e] sm:$0xff] }
  0xd5   : > { %5383 = vmatprep.mubr.msk.f32.mxu1 %vm299_vm1, %v6805_v7  ;;  %5636 = vmatprep.mubr.msk.f32.mxu0 %vm299_vm1, %v3171_v8  ;;  %v3608_v8 = vld [vmem:[%s6115_s7 + $0x9e] sm:$0xff] }
  0xd6   : > { %4275 = vperm.xlu1 %6036, %v4129_v19   ;;  %v1892_v19 = vld [vmem:[%s6115_s7 + $0xab] sm:$0xff] }
  0xd7   : > { %4290 = vperm.xlu0 %6035, %v4132_v30   ;;  %v3615_v30 = vld [vmem:[%s6115_s7 + $0xd6] sm:$0xff] }
  0xd8   : > { %5384 = vmatmul.mubr.msk.f32.gmra.mrb[26].mxu1 %vm299_vm1, %v6821_v12  ;;  %5637 = vmatmul.mubr.msk.f32.gmra.mrb[8].mxu0 %vm299_vm1, %v3172_v14  ;;  %v3610_v14 = vld [vmem:[%s6115_s7 + $0xae] sm:$0xff] }
  0xd9   : > { %5386 = vmatprep.mubr.msk.f32.mxu1 %vm299_vm1, %v6825_v15  ;;  %5639 = vmatprep.mubr.msk.f32.mxu0 %vm299_vm1, %v3173_v16  ;;  %v3611_v16 = vld [vmem:[%s6115_s7 + $0xb6] sm:$0xff] }
  0xda   : > { %4285 = vperm.xlu1 %6036, %v4131_v29   ;;  %v1895_v29 = vld [vmem:[%s6115_s7 + $0xc3] sm:$0xff] }
  0xdb   : > { %4300 = vperm.xlu0 %6035, %v4134_v42   ;;  %v3618_v42 = vld [vmem:[%s6115_s7 + $0xee] sm:$0xff] }
  0xdc   : > { %5387 = vmatmul.mubr.msk.f32.gmra.mrb[28].mxu1 %vm299_vm1, %v6841_v22  ;;  %5640 = vmatmul.mubr.msk.f32.gmra.mrb[10].mxu0 %vm299_vm1, %v3174_v23  ;;  %v3613_v23 = vld [vmem:[%s6115_s7 + $0xc6] sm:$0xff] }
  0xdd   : > { %5389 = vmatprep.mubr.msk.f32.mxu1 %vm299_vm1, %v6845_v26  ;;  %5642 = vmatprep.mubr.msk.f32.mxu0 %vm299_vm1, %v3175_v27  ;;  %v3614_v27 = vld [vmem:[%s6115_s7 + $0xce] sm:$0xff] }
  0xde   : > { %4295 = vperm.xlu1 %6036, %v4133_v41   ;;  %v1898_v41 = vld [vmem:[%s6115_s7 + $0xdb] sm:$0xff] }
  0xdf   : > { %4310 = vperm.xlu0 %6035, %v4136_v57   ;;  %v3621_v57 = vld [vmem:[%s6115_s7 + $0x106] sm:$0xff] }
  0xe0   : > { %5390 = vmatmul.mubr.msk.f32.gmra.mrb[30].mxu1 %vm299_vm1, %v6861_v33  ;;  %5643 = vmatmul.mubr.msk.f32.gmra.mrb[12].mxu0 %vm299_vm1, %v3176_v34  ;;  %v3616_v34 = vld [vmem:[%s6115_s7 + $0xde] sm:$0xff] }
  0xe1   : > { %5392 = vmatprep.mubr.msk.f32.mxu1 %vm299_vm1, %v6865_v37  ;;  %5645 = vmatprep.mubr.msk.f32.mxu0 %vm299_vm1, %v3177_v38  ;;  %v3617_v38 = vld [vmem:[%s6115_s7 + $0xe6] sm:$0xff] }
  0xe2   : > { %4305 = vperm.xlu1 %6036, %v4135_v53   ;;  %v1901_v53 = vld [vmem:[%s6115_s7 + $0xf3] sm:$0xff] }
  0xe4   : > { %5393 = vmatmul.mubr.msk.f32.gmra.mrb[32].mxu1 %vm299_vm1, %v6881_v43  ;;  %5646 = vmatmul.mubr.msk.f32.gmra.mrb[14].mxu0 %vm299_vm1, %v3178_v45  ;;  %v3619_v45 = vld [vmem:[%s6115_s7 + $0xf6] sm:$0xff] }
  0xe5   : > { %5395 = vmatprep.mubr.msk.f32.mxu1 %vm299_vm1, %v6885_v49  ;;  %5648 = vmatprep.mubr.msk.f32.mxu0 %vm299_vm1, %v3179_v51  ;;  %v3620_v51 = vld [vmem:[%s6115_s7 + $0xfe] sm:$0xff] }
  0xe6   : > { %4315 = vperm.xlu1 %6036, %v4137_v6   ;;  %v3623_v6 = vld [vmem:[%s6115_s7 + $0x116] sm:$0xff] }
  0xe8   : > { %5396 = vmatmul.mubr.msk.f32.gmra.mrb[34].mxu1 %vm299_vm1, %v6901_v61  ;;  %5649 = vmatmul.mubr.msk.f32.gmra.mrb[16].mxu0 %vm299_vm1, %v3180_v63  ;;  %v3622_v63 = vld [vmem:[%s6115_s7 + $0x10e] sm:$0xff] }
  0xe9   : > { %5400 = vmatprep.mubr.msk.f32.mxu1 %vm299_vm1, %v6559_v13  ;;  %5651 = vmatprep.mubr.msk.f32.mxu0 %vm299_vm1, %v3181_v2  ;;  %v3184_v13 = vld [vmem:[%s6115_s7 + $0xcd] sm:$0xff]  ;;  %v1903_v2 = vld [vmem:[%s6115_s7 + $0x103] sm:$0xff] }
  0xec   : > { %5401 = vmatmul.mubr.msk.f32.vlgmr.msra.gmra.mrb[0].mxu1 %vm299_vm1, %v6575_v17  ;;  %5652 = vmatmul.mubr.msk.f32.gmra.mrb[18].mxu0 %vm299_vm1, %v3182_v50  ;;  %v3186_v17 = vld [vmem:[%s6115_s7 + $0xdd] sm:$0xff]  ;;  %v1904_v50 = vld [vmem:[%s6115_s7 + $0x10b] sm:$0xff] }
  0xed   : > { %5735 = vmatpush3.msk.msra.mxu1 %vm408_vm0, %v6037_v52  ;;  %5403 = vmatprep.mubr.msk.f32.mxu1 %vm299_vm1, %v6580_v18  ;;  %v3188_v18 = vld [vmem:[%s6115_s7 + $0xed] sm:$0xff] }
  0xee   : > { %5654 = vmatprep.mubr.msk.f32.mxu0 %vm299_vm1, %v3183_v4  ;;  %v3624_v4 = vld [vmem:[%s6115_s7 + $0x11e] sm:$0xff]  ;;  %v1905_v52 = vld [vmem:[%s6115_s7 + $0x113] sm:$0xff] }
  0xf0   : > { %5404 = vmatmul.mubr.msk.f32.gmra.mrb[2].mxu1 %vm299_vm1, %v6599_v1  ;;  %5655 = vmatmul.mubr.msk.f32.gmra.mrb[20].mxu0 %vm299_vm1, %v3184_v13  ;;  %v3189_v1 = vld [vmem:[%s6115_s7 + $0xf5] sm:$0xff]  ;;  %v3625_v13 = vld [vmem:[%s6115_s7 + $0x126] sm:$0xff] }
  0xf1   : > { %5406 = vmatprep.mubr.msk.f32.mxu1 %vm299_vm1, %v6602_v21  ;;  %5657 = vmatprep.mubr.msk.f32.mxu0 %vm299_vm1, %v3185_v56  ;;  %v3190_v21 = vld [vmem:[%s6115_s7 + $0xfd] sm:$0xff] }
  0xf2   : > { %v1906_v56 = vld [vmem:[%s6115_s7 + $0x11b] sm:$0xff] }
  0xf4   : > { %5407 = vmatmul.mubr.msk.f32.gmra.mrb[4].mxu1 %vm299_vm1, %v6619_v24  ;;  %5658 = vmatmul.mubr.msk.f32.gmra.mrb[22].mxu0 %vm299_vm1, %v3186_v17  ;;  %v3191_v24 = vld [vmem:[%s6115_s7 + $0x105] sm:$0xff]  ;;  %v3626_v17 = vld [vmem:[%s6115_s7 + $0x12e] sm:$0xff] }
  0xf5   : > { %5409 = vmatprep.mubr.msk.f32.mxu1 %vm299_vm1, %v6622_v25  ;;  %5660 = vmatprep.mubr.msk.f32.mxu0 %vm299_vm1, %v3187_v60  ;;  %v3192_v25 = vld [vmem:[%s6115_s7 + $0x10d] sm:$0xff]  ;;  %v1907_v60 = vld [vmem:[%s6115_s7 + $0x123] sm:$0xff] }
  0xf8   : > { %5410 = vmatmul.mubr.msk.f32.gmra.mrb[6].mxu1 %vm299_vm1, %v6639_v11  ;;  %5661 = vmatmul.mubr.msk.f32.gmra.mrb[24].mxu0 %vm299_vm1, %v3188_v18  ;;  %v3193_v11 = vld [vmem:[%s6115_s7 + $0x115] sm:$0xff] }
  0xf9   : > { %5412 = vmatprep.mubr.msk.f32.mxu1 %vm299_vm1, %v6642_v28  ;;  %5663 = vmatprep.mubr.msk.f32.mxu0 %vm299_vm1, %v3189_v1  ;;  %v3194_v28 = vld [vmem:[%s6115_s7 + $0x11d] sm:$0xff]  ;;  %v1908_v1 = vld [vmem:[%s6115_s7 + $0x12b] sm:$0xff] }
  0xfa   : > { %v3627_v18 = vld [vmem:[%s6115_s7 + $0x136] sm:$0xff] }
  0xfc   : > { %5413 = vmatmul.mubr.msk.f32.gmra.mrb[8].mxu1 %vm299_vm1, %v6659_v31  ;;  %5664 = vmatmul.mubr.msk.f32.gmra.mrb[26].mxu0 %vm299_vm1, %v3190_v21  ;;  %v3195_v31 = vld [vmem:[%s6115_s7 + $0x125] sm:$0xff] }
  0xfd   : > { %5415 = vmatprep.mubr.msk.f32.mxu1 %vm299_vm1, %v6662_v32  ;;  %5666 = vmatprep.mubr.msk.f32.mxu0 %vm299_vm1, %v3191_v24  ;;  %v3196_v32 = vld [vmem:[%s6115_s7 + $0x12d] sm:$0xff]  ;;  %v3628_v21 = vld [vmem:[%s6115_s7 + $0x13e] sm:$0xff] }
 0x100   : > { %5416 = vmatmul.mubr.msk.f32.gmra.mrb[10].mxu1 %vm299_vm1, %v6679_v35  ;;  %5667 = vmatmul.mubr.msk.f32.gmra.mrb[28].mxu0 %vm299_vm1, %v3192_v25  ;;  %v3197_v35 = vld [vmem:[%s6115_s7 + $0x135] sm:$0xff] }
 0x101   : > { %5418 = vmatprep.mubr.msk.f32.mxu1 %vm299_vm1, %v6682_v36  ;;  %5669 = vmatprep.mubr.msk.f32.mxu0 %vm299_vm1, %v3193_v11  ;;  %v3198_v36 = vld [vmem:[%s6115_s7 + $0x13d] sm:$0xff] }
 0x104   : > { %5419 = vmatmul.mubr.msk.f32.gmra.mrb[12].mxu1 %vm299_vm1, %v6699_v39  ;;  %5670 = vmatmul.mubr.msk.f32.gmra.mrb[30].mxu0 %vm299_vm1, %v3194_v28  ;;  %v3593_v39 = vld [vmem:[%s6115_s7 + $0x26] sm:$0xff] }
 0x105   : > { %5421 = vmatprep.mubr.msk.f32.mxu1 %vm299_vm1, %v6702_v40  ;;  %5672 = vmatprep.mubr.msk.f32.mxu0 %vm299_vm1, %v3195_v31  ;;  %v3594_v40 = vld [vmem:[%s6115_s7 + $0x2e] sm:$0xff] }
 0x108   : > { %5422 = vmatmul.mubr.msk.f32.gmra.mrb[14].mxu1 %vm299_vm1, %v6719_v44  ;;  %5673 = vmatmul.mubr.msk.f32.gmra.mrb[32].mxu0 %vm299_vm1, %v3196_v32  ;;  %v3595_v44 = vld [vmem:[%s6115_s7 + $0x36] sm:$0xff] }
 0x109   : > { %5424 = vmatprep.mubr.msk.f32.mxu1 %vm299_vm1, %v6723_v46  ;;  %5675 = vmatprep.mubr.msk.f32.mxu0 %vm299_vm1, %v3197_v35  ;;  %v3596_v46 = vld [vmem:[%s6115_s7 + $0x3e] sm:$0xff] }
 0x10c   : > { %5425 = vmatmul.mubr.msk.f32.gmra.mrb[16].mxu1 %vm299_vm1, %v6739_v55  ;;  %5676 = vmatmul.mubr.msk.f32.gmra.mrb[34].mxu0 %vm299_vm1, %v3198_v36  ;;  %v3597_v55 = vld [vmem:[%s6115_s7 + $0x46] sm:$0xff] }
 0x10d   : > { %5427 = vmatprep.mubr.msk.f32.mxu1 %vm299_vm1, %v6743_v59  ;;  %5680 = vmatprep.mubr.msk.f32.mxu0 %vm299_vm1, %v3593_v39  ;;  %v3598_v59 = vld [vmem:[%s6115_s7 + $0x4e] sm:$0xff] }
 0x110   : > { %5428 = vmatmul.mubr.msk.f32.gmra.mrb[18].mxu1 %vm299_vm1, %v6760_v47  ;;  %5681 = vmatmul.mubr.msk.f32.vlgmr.msra.gmra.mrb[0].mxu0 %vm299_vm1, %v3594_v40  ;;  %v3599_v47 = vld [vmem:[%s6115_s7 + $0x56] sm:$0xff] }
 0x111   : > { %5430 = vmatprep.mubr.msk.f32.mxu1 %vm299_vm1, %v6765_v48  ;;  %5683 = vmatprep.mubr.msk.f32.mxu0 %vm299_vm1, %v3595_v44  ;;  %v3600_v48 = vld [vmem:[%s6115_s7 + $0x5e] sm:$0xff] }
 0x114   : > { %5431 = vmatmul.mubr.msk.f32.gmra.mrb[20].mxu1 %vm299_vm1, %v6781_v54  ;;  %5684 = vmatmul.mubr.msk.f32.gmra.mrb[2].mxu0 %vm299_vm1, %v3596_v46  ;;  %v3601_v54 = vld [vmem:[%s6115_s7 + $0x66] sm:$0xff] }
 0x115   : > { %5433 = vmatprep.mubr.msk.f32.mxu1 %vm299_vm1, %v6785_v58  ;;  %5686 = vmatprep.mubr.msk.f32.mxu0 %vm299_vm1, %v3597_v55  ;;  %v3602_v58 = vld [vmem:[%s6115_s7 + $0x6e] sm:$0xff] }
 0x118   : > { %5434 = vmatmul.mubr.msk.f32.gmra.mrb[22].mxu1 %vm299_vm1, %v6801_v3  ;;  %5687 = vmatmul.mubr.msk.f32.gmra.mrb[4].mxu0 %vm299_vm1, %v3598_v59  ;;  %v3605_v3 = vld [vmem:[%s6115_s7 + $0x86] sm:$0xff] }
 0x119   : > { %5436 = vmatprep.mubr.msk.f32.mxu1 %vm299_vm1, %v6805_v7  ;;  %5689 = vmatprep.mubr.msk.f32.mxu0 %vm299_vm1, %v3599_v47  ;;  %v3607_v7 = vld [vmem:[%s6115_s7 + $0x96] sm:$0xff] }
 0x11a   : > { %v4141_v24 = vpop.permute.xlu0 %4140  ;;  %v7130_v25 = vpop.permute.xlu1 %4150 }
 0x11c   : > { %5437 = vmatmul.mubr.msk.f32.gmra.mrb[24].mxu1 %vm299_vm1, %v6821_v12  ;;  %5690 = vmatmul.mubr.msk.f32.gmra.mrb[6].mxu0 %vm299_vm1, %v3600_v48  ;;  %v1478_v12 = vld [vmem:[%s6115_s7 + $0x12a] sm:$0xff] }
 0x11d   : > { %5439 = vmatprep.mubr.msk.f32.mxu1 %vm299_vm1, %v6825_v15  ;;  %5692 = vmatprep.mubr.msk.f32.mxu0 %vm299_vm1, %v3601_v54  ;;  %v1891_v15 = vld [vmem:[%s6115_s7 + $0xa3] sm:$0xff] }
 0x11e   : > { %v4146_v31 = vpop.permute.xlu0 %4145  ;;  %v4156_v35 = vpop.permute.xlu1 %4155 }
 0x120   : > { %5440 = vmatmul.mubr.msk.f32.gmra.mrb[26].mxu1 %vm299_vm1, %v6841_v22  ;;  %5693 = vmatmul.mubr.msk.f32.gmra.mrb[8].mxu0 %vm299_vm1, %v3602_v58  ;;  %v1893_v22 = vld [vmem:[%s6115_s7 + $0xb3] sm:$0xff] }
 0x121   : > { %5442 = vmatprep.mubr.msk.f32.mxu1 %vm299_vm1, %v6845_v26  ;;  %5695 = vmatprep.mubr.msk.f32.mxu0 %vm299_vm1, %v3603_v62  ;;  %v1894_v26 = vld [vmem:[%s6115_s7 + $0xbb] sm:$0xff] }
 0x122   : > { %v7132_v44 = vpop.permute.xlu0 %4160  ;;  %v7134_v46 = vpop.permute.xlu1 %4165 }
 0x124   : > { %5443 = vmatmul.mubr.msk.f32.gmra.mrb[28].mxu1 %vm299_vm1, %v6861_v33  ;;  %5696 = vmatmul.mubr.msk.f32.gmra.mrb[10].mxu0 %vm299_vm1, %v3604_v0  ;;  %v1896_v33 = vld [vmem:[%s6115_s7 + $0xcb] sm:$0xff] }
 0x125   : > { %5445 = vmatprep.mubr.msk.f32.mxu1 %vm299_vm1, %v6865_v37  ;;  %5698 = vmatprep.mubr.msk.f32.mxu0 %vm299_vm1, %v3605_v3  ;;  %v1897_v37 = vld [vmem:[%s6115_s7 + $0xd3] sm:$0xff] }
 0x126   : > { %v7140_v47 = vpop.permute.xlu0 %4170  ;;  %v7144_v54 = vpop.permute.xlu1 %4175 }
 0x128   : > { %5446 = vmatmul.mubr.msk.f32.gmra.mrb[30].mxu1 %vm299_vm1, %v6881_v43  ;;  %5699 = vmatmul.mubr.msk.f32.gmra.mrb[12].mxu0 %vm299_vm1, %v3606_v5  ;;  %v1899_v43 = vld [vmem:[%s6115_s7 + $0xe3] sm:$0xff] }
 0x129   : > { %5448 = vmatprep.mubr.msk.f32.mxu1 %vm299_vm1, %v6885_v49  ;;  %5701 = vmatprep.mubr.msk.f32.mxu0 %vm299_vm1, %v3607_v7  ;;  %v1900_v49 = vld [vmem:[%s6115_s7 + $0xeb] sm:$0xff] }
 0x12a   : > { %v7152_v3 = vpop.permute.xlu0 %4180  ;;  %v7154_v5 = vpop.permute.xlu1 %4185 }
 0x12c   : > { %5449 = vmatmul.mubr.msk.f32.gmra.mrb[32].mxu1 %vm299_vm1, %v6901_v61  ;;  %5702 = vmatmul.mubr.msk.f32.gmra.mrb[14].mxu0 %vm299_vm1, %v3608_v8  ;;  %v1902_v61 = vld [vmem:[%s6115_s7 + $0xfb] sm:$0xff]  ;;  %s218_s7 = smul.u32 36, %s6084_s19 }
 0x12d   : > { %5451 = vmatprep.mubr.msk.f32.mxu1 %vm299_vm1, %v1477_v9  ;;  %5704 = vmatprep.mubr.msk.f32.mxu0 %vm299_vm1, %v3609_v10 }
 0x12e   : > { %p219_p4 = scmp.lt.s32.totalorder %s218_s7, 71  ;;  %v7161_v9 = vpop.permute.xlu0 %4190 }
 0x130   : > { %5452 = vmatmul.mubr.msk.f32.gmra.mrb[34].mxu1 %vm299_vm1, %v1478_v12  ;;  %5705 = vmatmul.mubr.msk.f32.gmra.mrb[16].mxu0 %vm299_vm1, %v3610_v14  ;;  %v7165_v12 = vpop.permute.xlu1 %4195  ;;  %s7350_s7 = smov (!%p219_p4, %s218_s7), 71 }
 0x131   : > { %5483 = vmatprep.mubr.msk.f32.mxu1 %vm299_vm1, %v1891_v15  ;;  %5707 = vmatprep.mubr.msk.f32.mxu0 %vm299_vm1, %v3611_v16  ;;  %s4551_s28 = sshll.u32 %s7350_s7, 3 }
 0x132   : > { %s7185_s9 = scalar_lea.vmem %s7347_s4, %s4551_s28 }
 0x134   : > { %5484 = vmatmul.mubr.msk.f32.vlgmr.msra.gmra.mrb[18].mxu1 %vm299_vm1, %v1892_v19  ;;  %5708 = vmatmul.mubr.msk.f32.gmra.mrb[18].mxu0 %vm299_vm1, %v3612_v20  ;;  %v7173_v19 = vpop.permute.xlu0 %4200  ;;  %v7175_v20 = vpop.permute.xlu1 %4205 }
 0x135   : > { %5486 = vmatprep.mubr.msk.f32.mxu1 %vm299_vm1, %v1893_v22  ;;  %5710 = vmatprep.mubr.msk.f32.mxu0 %vm299_vm1, %v3613_v23  ;;  %v7180_v23 = vld [vmem:[%s7345_s2] ss:$0 sm:$0xff] }
 0x138   : > { %5487 = vmatmul.mubr.msk.f32.gmra.mrb[20].mxu1 %vm299_vm1, %v1894_v26  ;;  %5711 = vmatmul.mubr.msk.f32.gmra.mrb[20].mxu0 %vm299_vm1, %v3614_v27 }
 0x139   : > { %5489 = vmatprep.mubr.msk.f32.mxu1 %vm299_vm1, %v1895_v29  ;;  %5713 = vmatprep.mubr.msk.f32.mxu0 %vm299_vm1, %v3615_v30 }
 0x13c   : > { %5490 = vmatmul.mubr.msk.f32.gmra.mrb[22].mxu1 %vm299_vm1, %v1896_v33  ;;  %5714 = vmatmul.mubr.msk.f32.gmra.mrb[22].mxu0 %vm299_vm1, %v3616_v34  ;;  %v7188_v33 = vpop.permute.xlu0 %4210 }
 0x13d   : > { %5492 = vmatprep.mubr.msk.f32.mxu1 %vm299_vm1, %v1897_v37  ;;  %5716 = vmatprep.mubr.msk.f32.mxu0 %vm299_vm1, %v3617_v38  ;;  %v7191_v38 = vpop.permute.xlu1 %4215 }
 0x140   : > { %5493 = vmatmul.mubr.msk.f32.gmra.mrb[24].mxu1 %vm299_vm1, %v1898_v41  ;;  %5717 = vmatmul.mubr.msk.f32.gmra.mrb[24].mxu0 %vm299_vm1, %v3618_v42 }
 0x141   : > { %5495 = vmatprep.mubr.msk.f32.mxu1 %vm299_vm1, %v1899_v43  ;;  %5719 = vmatprep.mubr.msk.f32.mxu0 %vm299_vm1, %v3619_v45 }
 0x144   : > { %5496 = vmatmul.mubr.msk.f32.gmra.mrb[26].mxu1 %vm299_vm1, %v1900_v49  ;;  %5720 = vmatmul.mubr.msk.f32.gmra.mrb[26].mxu0 %vm299_vm1, %v3620_v51 }
 0x145   : > { %5498 = vmatprep.mubr.msk.f32.mxu1 %vm299_vm1, %v1901_v53  ;;  %5722 = vmatprep.mubr.msk.f32.mxu0 %vm299_vm1, %v3621_v57 }
 0x148   : > { %5499 = vmatmul.mubr.msk.f32.gmra.mrb[28].mxu1 %vm299_vm1, %v1902_v61  ;;  %5723 = vmatmul.mubr.msk.f32.gmra.mrb[28].mxu0 %vm299_vm1, %v3622_v63 }
 0x149   : > { %5501 = vmatprep.mubr.msk.f32.mxu1 %vm299_vm1, %v1903_v2  ;;  %5725 = vmatprep.mubr.msk.f32.mxu0 %vm299_vm1, %v3623_v6 }
 0x14c   : > { %5502 = vmatmul.mubr.msk.f32.gmra.mrb[30].mxu1 %vm299_vm1, %v1904_v50  ;;  %5726 = vmatmul.mubr.msk.f32.gmra.mrb[30].mxu0 %vm299_vm1, %v3624_v4 }
 0x14d   : > { %5504 = vmatprep.mubr.msk.f32.mxu1 %vm299_vm1, %v1905_v52  ;;  %5728 = vmatprep.mubr.msk.f32.mxu0 %vm299_vm1, %v3625_v13  ;;  %v7198_v52 = vpop.permute.xlu0 %4220 }
 0x150   : > { %5505 = vmatmul.mubr.msk.f32.gmra.mrb[32].mxu1 %vm299_vm1, %v1906_v56  ;;  %5729 = vmatmul.mubr.msk.f32.gmra.mrb[32].mxu0 %vm299_vm1, %v3626_v17 }
 0x151   : > { %5507 = vmatprep.mubr.msk.f32.mxu1 %vm299_vm1, %v1907_v60  ;;  %5731 = vmatprep.mubr.msk.f32.mxu0 %vm299_vm1, %v3627_v18  ;;  %v7202_v60 = vpop.permute.xlu1 %4225 }
 0x154   : > { %5508 = vmatmul.mubr.msk.f32.gmra.mrb[34].mxu1 %vm299_vm1, %v1908_v1  ;;  %5732 = vmatmul.mubr.msk.f32.gmra.mrb[34].mxu0 %vm299_vm1, %v3628_v21 }
 0x1bf   : > { %v5402_v11 = vpop.f32.mrb[0].mxu1 }
 0x1c0   : > { %v1658_v28 = vpop.f32.mrb[1].mxu1 }
 0x1c3   : > { %v5405_v32 = vpop.f32.mrb[2].mxu1 }
 0x1c4   : > { %v1668_v36 = vpop.f32.mrb[3].mxu1 }
 0x1c7   : > { %v5408_v39 = vpop.f32.mrb[4].mxu1 }
 0x1c8   : > { %v1678_v40 = vpop.f32.mrb[5].mxu1 }
 0x1cb   : > { %v7136_v55 = vpop.f32.mrb[6].mxu1 }
 0x1cc   : > { %v7138_v59 = vpop.f32.mrb[7].mxu1 }
 0x1cf   : > { %v7142_v48 = vpop.f32.mrb[8].mxu1 }
 0x1d0   : > { %v7146_v58 = vpop.f32.mrb[9].mxu1 }
 0x1d3   : > { %v7148_v62 = vpop.f32.mrb[10].mxu1 }
 0x1d4   : > { %v7150_v0 = vpop.f32.mrb[11].mxu1 }
 0x1d7   : > { %v7157_v7 = vpop.f32.mrb[12].mxu1 }
 0x1d8   : > { %v7159_v8 = vpop.f32.mrb[13].mxu1 }
 0x1db   : > { %v7163_v10 = vpop.f32.mrb[14].mxu1 }
 0x1dc   : > { %v7167_v14 = vpop.f32.mrb[15].mxu1 }
 0x1df   : > { %v7169_v15 = vpop.f32.mrb[16].mxu1 }
 0x1e0   : > { %v7171_v16 = vpop.f32.mrb[17].mxu1 }
 0x1e3   : > { %v5682_v22 = vpop.f32.mrb[0].mxu0 }
 0x1e4   : > { %v5736_v26 = vadd.f32 %v5682_v22, %v5402_v11  ;;  %v3808_v27 = vpop.f32.mrb[1].mxu0 }
 0x1e5   : > { %v5737_v29 = vadd.f32 %v3808_v27, %v1658_v28 }
 0x1e6   : > { %v4031_v30 = vadd.f32 %v5736_v26, %v7180_v23  ;;  %v7213_v26 = vpop.permute.xlu0 %4230 }
 0x1e7   : > { %v4030_v34 = vadd.f32 %v5737_v29, %v7180_v23  ;;  %v5685_v37 = vpop.f32.mrb[2].mxu0 }
 0x1e8   : > { %4067 = vst [vmem:[%s7185_s9 + $0x8] sm:$0xff] %v4031_v30  ;;  %v4319_v41 = vmul.f32 %v4146_v31, %v4031_v30  ;;  %v5738_v42 = vadd.f32 %v5685_v37, %v5405_v32  ;;  %v3818_v43 = vpop.f32.mrb[3].mxu0 }
 0x1e9   : > { %4066 = vst [vmem:[%s7185_s9] sm:$0xff] %v4030_v34  ;;  %v4318_v45 = vmul.f32 %v4141_v24, %v4030_v34  ;;  %v5739_v49 = vadd.f32 %v3818_v43, %v1668_v36 }
 0x1ea   : > { %v4396_v51 = vmul.f32 %v4319_v41, %v4031_v30  ;;  %v4033_v53 = vadd.f32 %v5738_v42, %v7180_v23 }
 0x1eb   : > { %v4354_v57 = vadd.f32 %v4319_v41, %v4318_v45  ;;  %v4395_v61 = vmul.f32 %v4318_v45, %v4030_v34  ;;  %v4032_v63 = vadd.f32 %v5739_v49, %v7180_v23  ;;  %v5688_v2 = vpop.f32.mrb[4].mxu0  ;;  %v7216_v34 = vpop.permute.xlu1 %4235 }
 0x1ec   : > { %4069 = vst [vmem:[%s7185_s9 + $0x18] sm:$0xff] %v4033_v53  ;;  %v4321_v6 = vmul.f32 %v4156_v35, %v4033_v53  ;;  %v5740_v50 = vadd.f32 %v5688_v2, %v5408_v39  ;;  %v3828_v4 = vpop.f32.mrb[5].mxu0 }
 0x1ed   : > { %v4431_v13 = vadd.f32 %v4396_v51, %v4395_v61  ;;  %4068 = vst [vmem:[%s7185_s9 + $0x10] sm:$0xff] %v4032_v63  ;;  %v4320_v56 = vmul.f32 %v7130_v25, %v4032_v63  ;;  %v5741_v17 = vadd.f32 %v3828_v4, %v1678_v40 }
 0x1ee   : > { %v4035_v18 = vadd.f32 %v5740_v50, %v7180_v23  ;;  %v4398_v28 = vmul.f32 %v4321_v6, %v4033_v53  ;;  %v7229_v50 = vpop.permute.xlu0 %4240 }
 0x1ef   : > { %v4355_v1 = vadd.f32 %v4354_v57, %v4320_v56  ;;  %v4397_v21 = vmul.f32 %v4320_v56, %v4032_v63  ;;  %v4034_v24 = vadd.f32 %v5741_v17, %v7180_v23  ;;  %v5691_v11 = vpop.f32.mrb[6].mxu0  ;;  %v7234_v17 = vpop.permute.xlu1 %4245 }
 0x1f0   : > { %4071 = vst [vmem:[%s7185_s9 + $0x28] sm:$0xff] %v4035_v18  ;;  %v4323_v31 = vmul.f32 %v7134_v46, %v4035_v18  ;;  %v5742_v32 = vadd.f32 %v5691_v11, %v7136_v55  ;;  %v3838_v35 = vpop.f32.mrb[7].mxu0 }
 0x1f1   : > { %v4432_v36 = vadd.f32 %v4431_v13, %v4397_v21  ;;  %4070 = vst [vmem:[%s7185_s9 + $0x20] sm:$0xff] %v4034_v24  ;;  %v4322_v25 = vmul.f32 %v7132_v44, %v4034_v24  ;;  %v4356_v39 = vadd.f32 %v4355_v1, %v4321_v6  ;;  %v5743_v40 = vadd.f32 %v3838_v35, %v7138_v59 }
 0x1f2   : > { %v4037_v22 = vadd.f32 %v5742_v32, %v7180_v23  ;;  %v4400_v37 = vmul.f32 %v4323_v31, %v4035_v18 }
 0x1f3   : > { %v4357_v27 = vadd.f32 %v4356_v39, %v4322_v25  ;;  %v4399_v29 = vmul.f32 %v4322_v25, %v4034_v24  ;;  %v4433_v30 = vadd.f32 %v4432_v36, %v4398_v28  ;;  %v4036_v46 = vadd.f32 %v5743_v40, %v7180_v23  ;;  %v5694_v55 = vpop.f32.mrb[8].mxu0  ;;  %v7245_v39 = vpop.permute.xlu0 %4250 }
 0x1f4   : > { %4073 = vst [vmem:[%s7185_s9 + $0x38] sm:$0xff] %v4037_v22  ;;  %v4325_v44 = vmul.f32 %v7144_v54, %v4037_v22  ;;  %v5744_v41 = vadd.f32 %v5694_v55, %v7142_v48  ;;  %v3848_v59 = vpop.f32.mrb[9].mxu0 }
 0x1f5   : > { %v4434_v42 = vadd.f32 %v4433_v30, %v4399_v29  ;;  %4072 = vst [vmem:[%s7185_s9 + $0x30] sm:$0xff] %v4036_v46  ;;  %v4324_v43 = vmul.f32 %v7140_v47, %v4036_v46  ;;  %v4358_v45 = vadd.f32 %v4357_v27, %v4323_v31  ;;  %v5745_v49 = vadd.f32 %v3848_v59, %v7146_v58  ;;  %v7248_v29 = vpop.permute.xlu1 %4255 }
 0x1f6   : > { %v4039_v51 = vadd.f32 %v5744_v41, %v7180_v23  ;;  %v4402_v54 = vmul.f32 %v4325_v44, %v4037_v22 }
 0x1f7   : > { %v4359_v53 = vadd.f32 %v4358_v45, %v4324_v43  ;;  %v4401_v57 = vmul.f32 %v4324_v43, %v4036_v46  ;;  %v4435_v61 = vadd.f32 %v4434_v42, %v4400_v37  ;;  %v4038_v63 = vadd.f32 %v5745_v49, %v7180_v23  ;;  %v5697_v2 = vpop.f32.mrb[10].mxu0 }
 0x1f8   : > { %4075 = vst [vmem:[%s7185_s9 + $0x48] sm:$0xff] %v4039_v51  ;;  %v4327_v48 = vmul.f32 %v7154_v5, %v4039_v51  ;;  %v5746_v6 = vadd.f32 %v5697_v2, %v7148_v62  ;;  %v3858_v47 = vpop.f32.mrb[11].mxu0  ;;  %v7264_v2 = vpop.permute.xlu0 %4260 }
 0x1f9   : > { %v4436_v4 = vadd.f32 %v4435_v61, %v4401_v57  ;;  %4074 = vst [vmem:[%s7185_s9 + $0x40] sm:$0xff] %v4038_v63  ;;  %v4326_v58 = vmul.f32 %v7152_v3, %v4038_v63  ;;  %v4360_v13 = vadd.f32 %v4359_v53, %v4325_v44  ;;  %v5747_v56 = vadd.f32 %v3858_v47, %v7150_v0 }
 0x1fa   : > { %v4041_v18 = vadd.f32 %v5746_v6, %v7180_v23  ;;  %v4404_v11 = vmul.f32 %v4327_v48, %v4039_v51 }
 0x1fb   : > { %v4361_v1 = vadd.f32 %v4360_v13, %v4326_v58  ;;  %v4403_v5 = vmul.f32 %v4326_v58, %v4038_v63  ;;  %v4437_v21 = vadd.f32 %v4436_v4, %v4402_v54  ;;  %v4040_v62 = vadd.f32 %v5747_v56, %v7180_v23  ;;  %v5700_v24 = vpop.f32.mrb[12].mxu0  ;;  %v7266_v54 = vpop.permute.xlu1 %4265 }
 0x1fc   : > { %4077 = vst [vmem:[%s7185_s9 + $0x58] sm:$0xff] %v4041_v18  ;;  %v4329_v28 = vmul.f32 %v7165_v12, %v4041_v18  ;;  %v5748_v3 = vadd.f32 %v5700_v24, %v7157_v7  ;;  %v3868_v31 = vpop.f32.mrb[13].mxu0 }
 0x1fd   : > { %v4438_v32 = vadd.f32 %v4437_v21, %v4403_v5  ;;  %4076 = vst [vmem:[%s7185_s9 + $0x50] sm:$0xff] %v4040_v62  ;;  %v4328_v0 = vmul.f32 %v7161_v9, %v4040_v62  ;;  %v4362_v35 = vadd.f32 %v4361_v1, %v4327_v48  ;;  %v5749_v36 = vadd.f32 %v3868_v31, %v7159_v8 }
 0x1fe   : > { %v4043_v25 = vadd.f32 %v5748_v3, %v7180_v23  ;;  %v4406_v30 = vmul.f32 %v4329_v28, %v4041_v18 }
 0x1ff   : > { %v4363_v40 = vadd.f32 %v4362_v35, %v4328_v0  ;;  %v4405_v22 = vmul.f32 %v4328_v0, %v4040_v62  ;;  %v4439_v27 = vadd.f32 %v4438_v32, %v4404_v11  ;;  %v4042_v12 = vadd.f32 %v5749_v36, %v7180_v23  ;;  %v5703_v7 = vpop.f32.mrb[14].mxu0 }
 0x200   : > { %4079 = vst [vmem:[%s7185_s9 + $0x68] sm:$0xff] %v4043_v25  ;;  %v4331_v9 = vmul.f32 %v7175_v20, %v4043_v25  ;;  %v5750_v46 = vadd.f32 %v5703_v7, %v7163_v10  ;;  %v3878_v8 = vpop.f32.mrb[15].mxu0  ;;  %v7280_v7 = vpop.permute.xlu0 %4270 }
 0x201   : > { %v4440_v55 = vadd.f32 %v4439_v27, %v4405_v22  ;;  %4078 = vst [vmem:[%s7185_s9 + $0x60] sm:$0xff] %v4042_v12  ;;  %v4330_v37 = vmul.f32 %v7173_v19, %v4042_v12  ;;  %v4364_v44 = vadd.f32 %v4363_v40, %v4329_v28  ;;  %v5751_v41 = vadd.f32 %v3878_v8, %v7167_v14 }
 0x202   : > { %v4045_v59 = vadd.f32 %v5750_v46, %v7180_v23  ;;  %v4408_v20 = vmul.f32 %v4331_v9, %v4043_v25 }
 0x203   : > { %v4365_v42 = vadd.f32 %v4364_v44, %v4330_v37  ;;  %v4407_v43 = vmul.f32 %v4330_v37, %v4042_v12  ;;  %v4441_v45 = vadd.f32 %v4440_v55, %v4406_v30  ;;  %v4044_v49 = vadd.f32 %v5751_v41, %v7180_v23  ;;  %v5706_v51 = vpop.f32.mrb[16].mxu0  ;;  %v7282_v30 = vpop.permute.xlu1 %4275 }
 0x204   : > { %4081 = vst [vmem:[%s7185_s9 + $0x78] sm:$0xff] %v4045_v59  ;;  %v4333_v10 = vmul.f32 %v7191_v38, %v4045_v59  ;;  %v5752_v53 = vadd.f32 %v5706_v51, %v7169_v15  ;;  %v3888_v57 = vpop.f32.mrb[17].mxu0 }
 0x205   : > { %v4442_v19 = vadd.f32 %v4441_v45, %v4407_v43  ;;  %4080 = vst [vmem:[%s7185_s9 + $0x70] sm:$0xff] %v4044_v49  ;;  %v4332_v14 = vmul.f32 %v7188_v33, %v4044_v49  ;;  %v4366_v61 = vadd.f32 %v4365_v42, %v4331_v9  ;;  %v5753_v63 = vadd.f32 %v3888_v57, %v7171_v16 }
 0x206   : > { %v4047_v48 = vadd.f32 %v5752_v53, %v7180_v23  ;;  %v4410_v13 = vmul.f32 %v4333_v10, %v4045_v59 }
 0x207   : > { %v4367_v6 = vadd.f32 %v4366_v61, %v4332_v14  ;;  %v4409_v38 = vmul.f32 %v4332_v14, %v4044_v49  ;;  %v4443_v47 = vadd.f32 %v4442_v19, %v4408_v20  ;;  %v4046_v15 = vadd.f32 %v5753_v63, %v7180_v23  ;;  %v5485_v4 = vpop.f32.mrb[18].mxu1  ;;  %v5709_v58 = vpop.f32.mrb[18].mxu0 }
 0x208   : > { %4083 = vst [vmem:[%s7185_s9 + $0x88] sm:$0xff] %v4047_v48  ;;  %v4335_v33 = vmul.f32 %v7202_v60, %v4047_v48  ;;  %v5754_v56 = vadd.f32 %v5709_v58, %v5485_v4  ;;  %v2178_v16 = vpop.f32.mrb[19].mxu1  ;;  %v3898_v18 = vpop.f32.mrb[19].mxu0 }
 0x209   : > { %v4444_v1 = vadd.f32 %v4443_v47, %v4409_v38  ;;  %4082 = vst [vmem:[%s7185_s9 + $0x80] sm:$0xff] %v4046_v15  ;;  %v4334_v5 = vmul.f32 %v7198_v52, %v4046_v15  ;;  %v4368_v21 = vadd.f32 %v4367_v6, %v4333_v10  ;;  %v5755_v62 = vadd.f32 %v3898_v18, %v2178_v16 }
 0x20a   : > { %v4049_v24 = vadd.f32 %v5754_v56, %v7180_v23  ;;  %v4412_v0 = vmul.f32 %v4335_v33, %v4047_v48 }
 0x20b   : > { %v4369_v11 = vadd.f32 %v4368_v21, %v4334_v5  ;;  %v4411_v28 = vmul.f32 %v4334_v5, %v4046_v15  ;;  %v4445_v3 = vadd.f32 %v4444_v1, %v4410_v13  ;;  %v4048_v31 = vadd.f32 %v5755_v62, %v7180_v23  ;;  %v5488_v32 = vpop.f32.mrb[20].mxu1  ;;  %v5712_v60 = vpop.f32.mrb[20].mxu0 }
 0x20c   : > { %4085 = vst [vmem:[%s7185_s9 + $0x98] sm:$0xff] %v4049_v24  ;;  %v4337_v35 = vmul.f32 %v7216_v34, %v4049_v24  ;;  %v5756_v36 = vadd.f32 %v5712_v60, %v5488_v32  ;;  %v2188_v25 = vpop.f32.mrb[21].mxu1  ;;  %v3908_v40 = vpop.f32.mrb[21].mxu0 }
 0x20d   : > { %v4446_v52 = vadd.f32 %v4445_v3, %v4411_v28  ;;  %4084 = vst [vmem:[%s7185_s9 + $0x90] sm:$0xff] %v4048_v31  ;;  %v4336_v22 = vmul.f32 %v7213_v26, %v4048_v31  ;;  %v4370_v27 = vadd.f32 %v4369_v11, %v4335_v33  ;;  %v5757_v12 = vadd.f32 %v3908_v40, %v2188_v25  ;;  %v4281_v13 = vpop.permute.xlu0 %4280  ;;  %v4286_v33 = vpop.permute.xlu1 %4285 }
 0x20e   : > { %v4051_v9 = vadd.f32 %v5756_v36, %v7180_v23  ;;  %v4414_v41 = vmul.f32 %v4337_v35, %v4049_v24 }
 0x20f   : > { %v4371_v46 = vadd.f32 %v4370_v27, %v4336_v22  ;;  %v4413_v8 = vmul.f32 %v4336_v22, %v4048_v31  ;;  %v4447_v34 = vadd.f32 %v4446_v52, %v4412_v0  ;;  %v4050_v55 = vadd.f32 %v5757_v12, %v7180_v23  ;;  %v5491_v37 = vpop.f32.mrb[22].mxu1  ;;  %v5715_v44 = vpop.f32.mrb[22].mxu0 }
 0x210   : > { %4087 = vst [vmem:[%s7185_s9 + $0xa8] sm:$0xff] %v4051_v9  ;;  %v4339_v26 = vmul.f32 %v7234_v17, %v4051_v9  ;;  %v5758_v59 = vadd.f32 %v5715_v44, %v5491_v37  ;;  %v2198_v42 = vpop.f32.mrb[23].mxu1  ;;  %v3918_v43 = vpop.f32.mrb[23].mxu0 }
 0x211   : > { %v4448_v45 = vadd.f32 %v4447_v34, %v4413_v8  ;;  %4086 = vst [vmem:[%s7185_s9 + $0xa0] sm:$0xff] %v4050_v55  ;;  %v4338_v49 = vmul.f32 %v7229_v50, %v4050_v55  ;;  %v4372_v51 = vadd.f32 %v4371_v46, %v4337_v35  ;;  %v5759_v20 = vadd.f32 %v3918_v43, %v2198_v42  ;;  %v4291_v37 = vpop.permute.xlu0 %4290  ;;  %v4296_v44 = vpop.permute.xlu1 %4295 }
 0x212   : > { %v4053_v10 = vadd.f32 %v5758_v59, %v7180_v23  ;;  %v4416_v63 = vmul.f32 %v4339_v26, %v4051_v9 }
 0x213   : > { %v4373_v53 = vadd.f32 %v4372_v51, %v4338_v49  ;;  %v4415_v57 = vmul.f32 %v4338_v49, %v4050_v55  ;;  %v4449_v19 = vadd.f32 %v4448_v45, %v4414_v41  ;;  %v4052_v14 = vadd.f32 %v5759_v20, %v7180_v23  ;;  %v5494_v61 = vpop.f32.mrb[24].mxu1  ;;  %v5718_v17 = vpop.f32.mrb[24].mxu0 }
 0x214   : > { %4089 = vst [vmem:[%s7185_s9 + $0xb8] sm:$0xff] %v4053_v10  ;;  %v4341_v48 = vmul.f32 %v7248_v29, %v4053_v10  ;;  %v5760_v6 = vadd.f32 %v5718_v17, %v5494_v61  ;;  %v2208_v38 = vpop.f32.mrb[25].mxu1  ;;  %v3928_v47 = vpop.f32.mrb[25].mxu0 }
 0x215   : > { %v4450_v50 = vadd.f32 %v4449_v19, %v4415_v57  ;;  %4088 = vst [vmem:[%s7185_s9 + $0xb0] sm:$0xff] %v4052_v14  ;;  %v4340_v15 = vmul.f32 %v7245_v39, %v4052_v14  ;;  %v4374_v4 = vadd.f32 %v4373_v53, %v4339_v26  ;;  %v5761_v58 = vadd.f32 %v3928_v47, %v2208_v38 }
 0x216   : > { %v4055_v56 = vadd.f32 %v5760_v6, %v7180_v23  ;;  %v4418_v62 = vmul.f32 %v4341_v48, %v4053_v10 }
 0x217   : > { %v4375_v16 = vadd.f32 %v4374_v4, %v4340_v15  ;;  %v4417_v18 = vmul.f32 %v4340_v15, %v4052_v14  ;;  %v4451_v1 = vadd.f32 %v4450_v50, %v4416_v63  ;;  %v4054_v29 = vadd.f32 %v5761_v58, %v7180_v23  ;;  %v5497_v5 = vpop.f32.mrb[26].mxu1  ;;  %v5721_v21 = vpop.f32.mrb[26].mxu0 }
 0x218   : > { %4091 = vst [vmem:[%s7185_s9 + $0xc8] sm:$0xff] %v4055_v56  ;;  %v4343_v24 = vmul.f32 %v7266_v54, %v4055_v56  ;;  %v5762_v11 = vadd.f32 %v5721_v21, %v5497_v5  ;;  %v2218_v39 = vpop.f32.mrb[27].mxu1  ;;  %v3938_v28 = vpop.f32.mrb[27].mxu0 }
 0x219   : > { %v4452_v3 = vadd.f32 %v4451_v1, %v4417_v18  ;;  %4090 = vst [vmem:[%s7185_s9 + $0xc0] sm:$0xff] %v4054_v29  ;;  %v4342_v31 = vmul.f32 %v7264_v2, %v4054_v29  ;;  %v4376_v32 = vadd.f32 %v4375_v16, %v4341_v48  ;;  %v5763_v60 = vadd.f32 %v3938_v28, %v2218_v39  ;;  %v4301_v1 = vpop.permute.xlu0 %4300 }
 0x21a   : > { %v4057_v0 = vadd.f32 %v5762_v11, %v7180_v23  ;;  %v4420_v22 = vmul.f32 %v4343_v24, %v4055_v56 }
 0x21b   : > { %v4377_v35 = vadd.f32 %v4376_v32, %v4342_v31  ;;  %v4419_v36 = vmul.f32 %v4342_v31, %v4054_v29  ;;  %v4453_v25 = vadd.f32 %v4452_v3, %v4418_v62  ;;  %v4056_v40 = vadd.f32 %v5763_v60, %v7180_v23  ;;  %v5500_v52 = vpop.f32.mrb[28].mxu1  ;;  %v5724_v54 = vpop.f32.mrb[28].mxu0 }
 0x21c   : > { %4093 = vst [vmem:[%s7185_s9 + $0xd8] sm:$0xff] %v4057_v0  ;;  %v4345_v27 = vmul.f32 %v7282_v30, %v4057_v0  ;;  %v5764_v12 = vadd.f32 %v5724_v54, %v5500_v52  ;;  %v2228_v9 = vpop.f32.mrb[29].mxu1  ;;  %v3948_v46 = vpop.f32.mrb[29].mxu0 }
 0x21d   : > { %v4454_v2 = vadd.f32 %v4453_v25, %v4419_v36  ;;  %4092 = vst [vmem:[%s7185_s9 + $0xd0] sm:$0xff] %v4056_v40  ;;  %v4344_v8 = vmul.f32 %v7280_v7, %v4056_v40  ;;  %v4378_v34 = vadd.f32 %v4377_v35, %v4343_v24  ;;  %v5765_v55 = vadd.f32 %v3948_v46, %v2228_v9  ;;  %v4306_v29 = vpop.permute.xlu1 %4305  ;;  %v4311_v9 = vpop.permute.xlu0 %4310 }
 0x21e   : > { %v4059_v41 = vadd.f32 %v5764_v12, %v7180_v23  ;;  %v4422_v49 = vmul.f32 %v4345_v27, %v4057_v0 }
 0x21f   : > { %v4379_v26 = vadd.f32 %v4378_v34, %v4344_v8  ;;  %v4421_v59 = vmul.f32 %v4344_v8, %v4056_v40  ;;  %v4455_v42 = vadd.f32 %v4454_v2, %v4420_v22  ;;  %v4058_v30 = vadd.f32 %v5765_v55, %v7180_v23  ;;  %v5503_v43 = vpop.f32.mrb[30].mxu1  ;;  %v5727_v45 = vpop.f32.mrb[30].mxu0 }
 0x220   : > { %4095 = vst [vmem:[%s7185_s9 + $0xe8] sm:$0xff] %v4059_v41  ;;  %v4347_v51 = vmul.f32 %v4286_v33, %v4059_v41  ;;  %v5766_v20 = vadd.f32 %v5727_v45, %v5503_v43  ;;  %v2238_v7 = vpop.f32.mrb[31].mxu1  ;;  %v3958_v10 = vpop.f32.mrb[31].mxu0 }
 0x221   : > { %v4456_v53 = vadd.f32 %v4455_v42, %v4421_v59  ;;  %4094 = vst [vmem:[%s7185_s9 + $0xe0] sm:$0xff] %v4058_v30  ;;  %v4346_v57 = vmul.f32 %v4281_v13, %v4058_v30  ;;  %v4380_v19 = vadd.f32 %v4379_v26, %v4345_v27  ;;  %v5767_v14 = vadd.f32 %v3958_v10, %v2238_v7  ;;  %v4316_v46 = vpop.permute.xlu1 %4315 }
 0x222   : > { %v4061_v61 = vadd.f32 %v5766_v20, %v7180_v23  ;;  %v4424_v50 = vmul.f32 %v4347_v51, %v4059_v41 }
 0x223   : > { %v4381_v17 = vadd.f32 %v4380_v19, %v4346_v57  ;;  %v4423_v63 = vmul.f32 %v4346_v57, %v4058_v30  ;;  %v4457_v48 = vadd.f32 %v4456_v53, %v4422_v49  ;;  %v4060_v6 = vadd.f32 %v5767_v14, %v7180_v23  ;;  %v5506_v38 = vpop.f32.mrb[32].mxu1  ;;  %v5730_v47 = vpop.f32.mrb[32].mxu0 }
 0x224   : > { %4097 = vst [vmem:[%s7185_s9 + $0xf8] sm:$0xff] %v4061_v61  ;;  %v4349_v15 = vmul.f32 %v4296_v44, %v4061_v61  ;;  %v5768_v4 = vadd.f32 %v5730_v47, %v5506_v38  ;;  %v2248_v58 = vpop.f32.mrb[33].mxu1  ;;  %v3968_v33 = vpop.f32.mrb[33].mxu0 }
 0x225   : > { %v4458_v13 = vadd.f32 %v4457_v48, %v4423_v63  ;;  %4096 = vst [vmem:[%s7185_s9 + $0xf0] sm:$0xff] %v4060_v6  ;;  %v4348_v56 = vmul.f32 %v4291_v37, %v4060_v6  ;;  %v4382_v16 = vadd.f32 %v4381_v17, %v4347_v51  ;;  %v5769_v18 = vadd.f32 %v3968_v33, %v2248_v58 }
 0x226   : > { %v4063_v5 = vadd.f32 %v5768_v4, %v7180_v23  ;;  %v4426_v3 = vmul.f32 %v4349_v15, %v4061_v61  ;;  %v6047_v17 = vmov (!%p4894_p5), 0.0  }
 0x227   : > { %v4383_v21 = vadd.f32 %v4382_v16, %v4348_v56  ;;  %v4425_v62 = vmul.f32 %v4348_v56, %v4060_v6  ;;  %v4459_v24 = vadd.f32 %v4458_v13, %v4424_v50  ;;  %v4062_v11 = vadd.f32 %v5769_v18, %v7180_v23  ;;  %v5509_v39 = vpop.f32.mrb[34].mxu1  ;;  %v5733_v28 = vpop.f32.mrb[34].mxu0  ;;  %4476 = vst [vmem:[%s7348_s5] sm:$0x3] (!%p4894_p5), %v6047_v17 }
 0x228   : > { %4099 = vst [vmem:[%s7185_s9 + $0x108] sm:$0xff] %v4063_v5  ;;  %v4351_v31 = vmul.f32 %v4306_v29, %v4063_v5  ;;  %v5770_v32 = vadd.f32 %v5733_v28, %v5509_v39  ;;  %v2258_v60 = vpop.f32.mrb[35].mxu1  ;;  %v3978_v0 = vpop.f32.mrb[35].mxu0 }
 0x229   : > { %v4460_v35 = vadd.f32 %v4459_v24, %v4425_v62  ;;  %4098 = vst [vmem:[%s7185_s9 + $0x100] sm:$0xff] %v4062_v11  ;;  %v4350_v36 = vmul.f32 %v4301_v1, %v4062_v11  ;;  %v4384_v25 = vadd.f32 %v4383_v21, %v4349_v15  ;;  %v5771_v40 = vadd.f32 %v3978_v0, %v2258_v60 }
 0x22a   : > { %v4065_v52 = vadd.f32 %v5770_v32, %v7180_v23  ;;  %v4428_v2 = vmul.f32 %v4351_v31, %v4063_v5 }
 0x22b   : > { %v4385_v54 = vadd.f32 %v4384_v25, %v4350_v36  ;;  %v4427_v22 = vmul.f32 %v4350_v36, %v4062_v11  ;;  %v4461_v27 = vadd.f32 %v4460_v35, %v4426_v3  ;;  %v4064_v12 = vadd.f32 %v5771_v40, %v7180_v23 }
 0x22c   : > { %4101 = vst [vmem:[%s7185_s9 + $0x118] sm:$0xff] %v4065_v52  ;;  %v4353_v34 = vmul.f32 %v4316_v46, %v4065_v52 }
 0x22d   : > { %v4462_v8 = vadd.f32 %v4461_v27, %v4427_v22  ;;  %4100 = vst [vmem:[%s7185_s9 + $0x110] sm:$0xff] %v4064_v12  ;;  %v4352_v55 = vmul.f32 %v4311_v9, %v4064_v12  ;;  %v4386_v37 = vadd.f32 %v4385_v54, %v4351_v31 }
 0x22e   : > { %v4430_v59 = vmul.f32 %v4353_v34, %v4065_v52 }
 0x22f   : > { %v4387_v44 = vadd.f32 %v4386_v37, %v4352_v55  ;;  %v4429_v41 = vmul.f32 %v4352_v55, %v4064_v12  ;;  %v4463_v26 = vadd.f32 %v4462_v8, %v4428_v2 }
 0x231   : > { %v4388_v42 = vadd.f32 %v4387_v44, %v4353_v34  ;;  %v4464_v30 = vadd.f32 %v4463_v26, %v4429_v41 }
 0x233   : > { %v4389_v43 = vrot.slane %v4388_v42, 4  ;;  %v4465_v45 = vadd.f32 %v4464_v30, %v4430_v59 }
 0x235   : > { %v4390_v49 = vadd.f32 %v4389_v43, %v4388_v42  ;;  %v4466_v51 = vrot.slane %v4465_v45, 4 }
 0x237   : > { %v4391_v23 = vrot.slane %v4390_v49, 2  ;;  %v4467_v20 = vadd.f32 %v4466_v51, %v4465_v45 }
 0x239   : > { %v4392_v7 = vadd.f32 %v4391_v23, %v4390_v49  ;;  %v4468_v10 = vrot.slane %v4467_v20, 2  ;;  %4475 = sbr.rel (%p4894_p5) target bundleno = 576 (0x240), region = 40 }
 0x23b   : > { %v4393_v53 = vrot.slane %v4392_v7, 1  ;;  %v4469_v57 = vadd.f32 %v4468_v10, %v4467_v20 }
 0x23d   : > { %v4394_v19 = vadd.f32 %v4393_v53, %v4392_v7  ;;  %v4470_v14 = vrot.slane %v4469_v57, 1 }
 0x23f   : > { %v4471_v61 = vadd.f32 %v4470_v14, %v4469_v57 }
 0x240 PF: > { %v4477_v63 = vld [vmem:[%s7348_s5] sm:$0x1]  ;;  %v4480_v48 = vld [vmem:[%s7348_s5 + $0x1] sm:$0x1] }
 0x241   : > { %v4478_v6 = vadd.f32 %v4477_v63, %v4394_v19  ;;  %v4481_v38 = vadd.f32 %v4480_v48, %v4471_v61 }
 0x243   : > { %4479 = vst [vmem:[%s7348_s5] sm:$0x1] %v4478_v6  ;;  %4482 = vst [vmem:[%s7348_s5 + $0x1] sm:$0x1] %v4481_v38 }
 0x244 PF: > { %s16_s18 = sadd.s32 1, %s6044_s18  }
 0x245   : > { %p13_p6 = scmp.ge.s32.totalorder %s16_s18, 4  }
 0x247   :  { %15 = sbr.rel (!%p13_p6) target bundleno = 1 (0x1), region = 86 }

</bundles_post_ra>
